<compile_context>
chip_gen: v7x
topology: tpu7x:2x2x1
jax: 0.10.0
libtpu: 0.0.40
codegen_flags: <defaults>
</compile_context>

<pallas_src>
import functools

import jax
import jax.numpy as jnp
from jax.experimental import pallas as pl
from jax.experimental.pallas import tpu as pltpu


def _round_up(x, m):
    return ((x + m - 1) // m) * m


def rbm_kernel(v0_ref, w_hid_ref, w_vis_ref, b_ref, c_ref, uh_ref, ug_ref,
               v_out_ref, h_out_ref, h0_out_ref, *,
               num_sampling_iter, num_categories, padded_visible):
    Bp = v0_ref.shape[0]
    C = num_categories
    Vp = padded_visible

    # Load the (tiny, pre-laid-out, tile-aligned) parameters once.
    w_hid = w_hid_ref[...]        # (C*Vp, Hp)   [c*Vp+v, h] = W[c, h, v]
    w_vis = w_vis_ref[...]        # (Hp, C*Vp)   [h, c*Vp+v] = W[c, h, v]
    b_row = b_ref[...]            # (1, C*Vp)
    c_row = c_ref[...]            # (1, Hp)      (padded entries = -30 -> h_pad ~ 0)

    def sample_h(v_flat, u):
        # log p(h|v)[b,h] = sum_{c,v} v[b,c,v] W[c,h,v] + c[h] -- ONE MXU matmul.
        logits = jnp.dot(v_flat, w_hid, preferred_element_type=jnp.float32) + c_row
        # sigmoid: exp on EUP, reciprocal pushed to EUP (approx vrcp, ~free slot).
        p = pl.reciprocal(1.0 + jnp.exp(-logits), approx=True)
        return (u < p).astype(jnp.float32)                  # Bernoulli sample

    def sample_v(h, u):
        # logits[b, c*Vp+v] = sum_h h[b,h] W[c,h,v] + b[c,v] -- ONE MXU matmul.
        logits = jnp.dot(h, w_vis, preferred_element_type=jnp.float32) + b_row
        # OneHotCategorical(softmax over c) via Gumbel-max, one batched draw
        # (u pre-clipped to (0,1) in the wrapper -> no clamp needed here).
        g = -jnp.log(-jnp.log(u))
        z = logits + g                                      # (Bp, C*Vp)
        # Argmax over the C category slices (each slice is vreg-aligned, Vp=128k).
        best = z[:, :Vp]
        best_idx = jnp.zeros((Bp, Vp), jnp.int32)
        for ci in range(1, C):
            zc = z[:, ci * Vp:(ci + 1) * Vp]
            better = zc > best
            best = jnp.where(better, zc, best)
            best_idx = jnp.where(better, ci, best_idx)
        # One-hot back into the flat category-major layout with one aligned concat.
        return jnp.concatenate(
            [(best_idx == ci).astype(jnp.float32) for ci in range(C)], axis=1)

    # h | v0
    h = sample_h(v0_ref[...], uh_ref[0])
    h0_out_ref[...] = h                                     # lane-dense store

    # Gibbs chain (statically unrolled; num_sampling_iter is small).
    v_flat = v0_ref[...]
    for t in range(num_sampling_iter):
        v_flat = sample_v(h, ug_ref[t])
        h = sample_h(v_flat, uh_ref[t + 1])

    v_out_ref[...] = v_flat                                 # lane-dense store
    h_out_ref[...] = h                                      # lane-dense store


@functools.partial(jax.jit, static_argnames=("num_sampling_iter",))
def rbm_forward(v0, W, b, c, key, num_sampling_iter=2):
    """RBM.forward.

    v0: (B, C, V) one-hot over the category axis (torch layout (B, C, V, 1)).
    W:  (C, H, V);  b: (C, V) (torch (C, V, 1));  c: (1, H) (torch (H, 1)).
    Returns (v, h, h_given_v0) in torch shapes (B,C,V,1), (B,H,1), (B,H,1).
    """
    B, C, V = v0.shape
    H = W.shape[1]
    Vp = _round_up(V, 128)                 # lane-align the per-category stride
    Hp = _round_up(H, 128)                 # lane-align hidden dim
    Bp = _round_up(max(B, 8), 8)           # sublane-align batch

    # Zero-pad and pre-lay-out both matmul views of W in the wrapper so the
    # kernel only does aligned 2-D matmuls.  Padded W rows/cols are zero and
    # padded c entries are large-negative, so padding never perturbs the real
    # logits (padded h ~ 0; padded lanes are sliced off below).
    W_p = jnp.zeros((C, Hp, Vp), jnp.float32).at[:, :H, :V].set(W)
    b_p = jnp.zeros((C, Vp), jnp.float32).at[:, :V].set(jnp.reshape(b, (C, V)))
    c_p = jnp.full((1, Hp), -30.0, jnp.float32).at[:, :H].set(
        jnp.reshape(c, (1, H)).astype(jnp.float32))
    v0_p = jnp.zeros((Bp, C, Vp), jnp.float32).at[:B, :, :V].set(v0)

    w_hid = jnp.transpose(W_p, (0, 2, 1)).reshape(C * Vp, Hp)   # [c*Vp+v, h]
    w_vis = jnp.transpose(W_p, (1, 0, 2)).reshape(Hp, C * Vp)   # [h, c*Vp+v]
    b_flat = b_p.reshape(1, C * Vp)
    v0_flat = v0_p.reshape(Bp, C * Vp)

    # One batched uniform draw per sampling need (Bernoulli + Gumbel), done in
    # the wrapper: keeps PRNG filler ops out of the kernel's issue slots.
    k_h, k_g = jax.random.split(key)
    n_g = max(num_sampling_iter, 1)
    u_h = jax.random.uniform(k_h, (num_sampling_iter + 1, Bp, Hp),
                             dtype=jnp.float32)
    u_g = jax.random.uniform(k_g, (n_g, Bp, C * Vp), dtype=jnp.float32,
                             minval=1e-7, maxval=1.0 - 1e-7)

    kernel = functools.partial(
        rbm_kernel,
        num_sampling_iter=num_sampling_iter,
        num_categories=C,
        padded_visible=Vp,
    )
    vmem = pl.BlockSpec(memory_space=pltpu.MemorySpace.VMEM)
    out_shapes = (
        jax.ShapeDtypeStruct((Bp, C * Vp), jnp.float32),   # v (flat, padded)
        jax.ShapeDtypeStruct((Bp, Hp), jnp.float32),       # h
        jax.ShapeDtypeStruct((Bp, Hp), jnp.float32),       # h_given_v0
    )
    v_flat, h_p, h0_p = pl.pallas_call(
        kernel,
        out_shape=out_shapes,
        in_specs=[vmem] * 7,
        out_specs=(vmem, vmem, vmem),
    )(v0_flat, w_hid, w_vis, b_flat, c_p, u_h, u_g)

    # Strip padding and restore the PyTorch output layout:
    # v (B,C,V,1), h / h0 (B,H,1).
    v = v_flat.reshape(Bp, C, Vp)[:B, :, :V]
    h = h_p[:B, :H]
    h0 = h0_p[:B, :H]
    return v[..., None], h[..., None], h0[..., None]


if __name__ == "__main__":
    B = 4
    num_categories, num_hidden, num_visible = 5, 25, 50
    num_sampling_iter = 2

    key = jax.random.PRNGKey(0)
    kW, kb, kc, kv, ks = jax.random.split(key, 5)

    # Deterministic parameter init matching torch.nn.init.normal_(std=0.01).
    W = 0.01 * jax.random.normal(kW, (num_categories, num_hidden, num_visible),
                                 dtype=jnp.float32)
    b = 0.01 * jax.random.normal(kb, (num_categories, num_visible),
                                 dtype=jnp.float32)   # torch shape (C, V, 1)
    c = 0.01 * jax.random.normal(kc, (1, num_hidden),
                                 dtype=jnp.float32)   # torch shape (H, 1)

    # One-hot categorical visible input, layout (B, C, V)  (torch: (B, C, V, 1)).
    cats = jax.random.randint(kv, (B, num_visible), 0, num_categories)
    v0 = jax.nn.one_hot(cats, num_categories, axis=1, dtype=jnp.float32)

    v, h, h0 = rbm_forward(v0, W, b, c, ks, num_sampling_iter=num_sampling_iter)
    jax.block_until_ready((v, h, h0))

    assert v.shape == (B, num_categories, num_visible, 1)
    assert h.shape == (B, num_hidden, 1)
    assert h0.shape == (B, num_hidden, 1)
    # Outputs are valid samples: v one-hot over categories, h / h0 binary.
    assert jnp.all(jnp.sum(v[..., 0], axis=1) == 1.0)
    assert jnp.all((v == 0.0) | (v == 1.0))
    assert jnp.all((h == 0.0) | (h == 1.0))
    assert jnp.all((h0 == 0.0) | (h0 == 1.0))

    print("KERNEL_OK")
</pallas_src>

<mosaic_0001>
module attributes {stable_mosaic.version = 11 : i64} {
  func.func @rbm_kernel(%arg0: memref<8x640xf32, #tpu.memory_space<vmem>>, %arg1: memref<640x128xf32, #tpu.memory_space<vmem>>, %arg2: memref<128x640xf32, #tpu.memory_space<vmem>>, %arg3: memref<1x640xf32, #tpu.memory_space<vmem>>, %arg4: memref<1x128xf32, #tpu.memory_space<vmem>>, %arg5: memref<3x8x128xf32, #tpu.memory_space<vmem>>, %arg6: memref<2x8x640xf32, #tpu.memory_space<vmem>>, %arg7: memref<8x640xf32, #tpu.memory_space<vmem>>, %arg8: memref<8x128xf32, #tpu.memory_space<vmem>>, %arg9: memref<8x128xf32, #tpu.memory_space<vmem>>) attributes {dimension_semantics = [], scalar_prefetch = 0 : i64, scratch_operands = 0 : i64, tpu.core_type = #tpu.core_type<tc>} {
    %c0 = arith.constant 0 : index
    %c0_0 = arith.constant 0 : index
    %0 = vector.load %arg1[%c0, %c0_0] : memref<640x128xf32, #tpu.memory_space<vmem>>, vector<640x128xf32>
    %c0_1 = arith.constant 0 : index
    %c0_2 = arith.constant 0 : index
    %1 = vector.load %arg2[%c0_1, %c0_2] : memref<128x640xf32, #tpu.memory_space<vmem>>, vector<128x640xf32>
    %c0_3 = arith.constant 0 : index
    %c0_4 = arith.constant 0 : index
    %2 = vector.load %arg3[%c0_3, %c0_4] : memref<1x640xf32, #tpu.memory_space<vmem>>, vector<1x640xf32>
    %c0_5 = arith.constant 0 : index
    %c0_6 = arith.constant 0 : index
    %3 = vector.load %arg4[%c0_5, %c0_6] : memref<1x128xf32, #tpu.memory_space<vmem>>, vector<1x128xf32>
    %c0_7 = arith.constant 0 : index
    %c0_8 = arith.constant 0 : index
    %4 = vector.load %arg0[%c0_7, %c0_8] : memref<8x640xf32, #tpu.memory_space<vmem>>, vector<8x640xf32>
    %c0_9 = arith.constant 0 : index
    %c0_10 = arith.constant 0 : index
    %c0_11 = arith.constant 0 : index
    %5 = vector.load %arg5[%c0_9, %c0_10, %c0_11] : memref<3x8x128xf32, #tpu.memory_space<vmem>>, vector<1x8x128xf32>
    %6 = vector.shape_cast %5 : vector<1x8x128xf32> to vector<8x128xf32>
    %cst = arith.constant dense<0.000000e+00> : vector<8x128xf32>
    %7 = tpu.matmul %4, %0, %cst {dimension_numbers = #tpu.dot_dimension_numbers<[1], [0], [0], [1], [0, 0, 1, 1], [], []>} : vector<8x640xf32>, vector<640x128xf32>, vector<8x128xf32> -> vector<8x128xf32>
    %8 = vector.broadcast %3 : vector<1x128xf32> to vector<8x128xf32>
    %9 = arith.addf %7, %8 : vector<8x128xf32>
    %cst_12 = arith.constant 0.000000e+00 : f32
    %10 = vector.broadcast %cst_12 : f32 to vector<8x128xf32>
    %11 = arith.subf %10, %9 : vector<8x128xf32>
    %12 = math.exp %11 : vector<8x128xf32>
    %cst_13 = arith.constant 1.000000e+00 : f32
    %13 = vector.broadcast %cst_13 : f32 to vector<8x128xf32>
    %14 = arith.addf %13, %12 : vector<8x128xf32>
    %15 = tpu.reciprocal %14 {approx = true} : vector<8x128xf32> -> vector<8x128xf32>
    %16 = arith.cmpf olt, %6, %15 : vector<8x128xf32>
    %17 = arith.extui %16 : vector<8x128xi1> to vector<8x128xi32>
    %18 = arith.sitofp %17 : vector<8x128xi32> to vector<8x128xf32>
    %c0_14 = arith.constant 0 : index
    %c0_15 = arith.constant 0 : index
    %19 = vector.load %arg9[%c0_14, %c0_15] : memref<8x128xf32, #tpu.memory_space<vmem>>, vector<8x128xf32>
    tpu.vector_store %arg9[%c0_14, %c0_15], %18 {strides = array<i32>} : memref<8x128xf32, #tpu.memory_space<vmem>>, vector<8x128xf32>,
    %c0_16 = arith.constant 0 : index
    %c0_17 = arith.constant 0 : index
    %c0_18 = arith.constant 0 : index
    %20 = vector.load %arg6[%c0_16, %c0_17, %c0_18] : memref<2x8x640xf32, #tpu.memory_space<vmem>>, vector<1x8x640xf32>
    %21 = vector.shape_cast %20 : vector<1x8x640xf32> to vector<8x640xf32>
    %cst_19 = arith.constant dense<0.000000e+00> : vector<8x640xf32>
    %22 = tpu.matmul %18, %1, %cst_19 {dimension_numbers = #tpu.dot_dimension_numbers<[1], [0], [0], [1], [0, 0, 1, 1], [], []>} : vector<8x128xf32>, vector<128x640xf32>, vector<8x640xf32> -> vector<8x640xf32>
    %23 = vector.broadcast %2 : vector<1x640xf32> to vector<8x640xf32>
    %24 = arith.addf %22, %23 : vector<8x640xf32>
    %25 = math.log %21 : vector<8x640xf32>
    %cst_20 = arith.constant 0.000000e+00 : f32
    %26 = vector.broadcast %cst_20 : f32 to vector<8x640xf32>
    %27 = arith.subf %26, %25 : vector<8x640xf32>
    %28 = math.log %27 : vector<8x640xf32>
    %cst_21 = arith.constant 0.000000e+00 : f32
    %29 = vector.broadcast %cst_21 : f32 to vector<8x640xf32>
    %30 = arith.subf %29, %28 : vector<8x640xf32>
    %31 = arith.addf %24, %30 : vector<8x640xf32>
    %32 = vector.extract_strided_slice %31 {offsets = [0, 0], sizes = [8, 128], strides = [1, 1]} : vector<8x640xf32> to vector<8x128xf32>
    %c0_i32 = arith.constant 0 : i32
    %33 = vector.broadcast %c0_i32 : i32 to vector<8x128xi32>
    %34 = vector.extract_strided_slice %31 {offsets = [0, 128], sizes = [8, 128], strides = [1, 1]} : vector<8x640xf32> to vector<8x128xf32>
    %35 = arith.cmpf ogt, %34, %32 : vector<8x128xf32>
    %36 = arith.select %35, %34, %32 : vector<8x128xi1>, vector<8x128xf32>
    %c1_i32 = arith.constant 1 : i32
    %37 = vector.broadcast %c1_i32 : i32 to vector<8x128xi32>
    %38 = arith.select %35, %37, %33 : vector<8x128xi1>, vector<8x128xi32>
    %39 = vector.extract_strided_slice %31 {offsets = [0, 256], sizes = [8, 128], strides = [1, 1]} : vector<8x640xf32> to vector<8x128xf32>
    %40 = arith.cmpf ogt, %39, %36 : vector<8x128xf32>
    %41 = arith.select %40, %39, %36 : vector<8x128xi1>, vector<8x128xf32>
    %c2_i32 = arith.constant 2 : i32
    %42 = vector.broadcast %c2_i32 : i32 to vector<8x128xi32>
    %43 = arith.select %40, %42, %38 : vector<8x128xi1>, vector<8x128xi32>
    %44 = vector.extract_strided_slice %31 {offsets = [0, 384], sizes = [8, 128], strides = [1, 1]} : vector<8x640xf32> to vector<8x128xf32>
    %45 = arith.cmpf ogt, %44, %41 : vector<8x128xf32>
    %46 = arith.select %45, %44, %41 : vector<8x128xi1>, vector<8x128xf32>
    %c3_i32 = arith.constant 3 : i32
    %47 = vector.broadcast %c3_i32 : i32 to vector<8x128xi32>
    %48 = arith.select %45, %47, %43 : vector<8x128xi1>, vector<8x128xi32>
    %49 = vector.extract_strided_slice %31 {offsets = [0, 512], sizes = [8, 128], strides = [1, 1]} : vector<8x640xf32> to vector<8x128xf32>
    %50 = arith.cmpf ogt, %49, %46 : vector<8x128xf32>
    %c4_i32 = arith.constant 4 : i32
    %51 = vector.broadcast %c4_i32 : i32 to vector<8x128xi32>
    %52 = arith.select %50, %51, %48 : vector<8x128xi1>, vector<8x128xi32>
    %c0_i32_22 = arith.constant 0 : i32
    %53 = vector.broadcast %c0_i32_22 : i32 to vector<8x128xi32>
    %54 = arith.cmpi eq, %52, %53 : vector<8x128xi32>
    %55 = arith.extui %54 : vector<8x128xi1> to vector<8x128xi32>
    %56 = arith.sitofp %55 : vector<8x128xi32> to vector<8x128xf32>
    %c1_i32_23 = arith.constant 1 : i32
    %57 = vector.broadcast %c1_i32_23 : i32 to vector<8x128xi32>
    %58 = arith.cmpi eq, %52, %57 : vector<8x128xi32>
    %59 = arith.extui %58 : vector<8x128xi1> to vector<8x128xi32>
    %60 = arith.sitofp %59 : vector<8x128xi32> to vector<8x128xf32>
    %c2_i32_24 = arith.constant 2 : i32
    %61 = vector.broadcast %c2_i32_24 : i32 to vector<8x128xi32>
    %62 = arith.cmpi eq, %52, %61 : vector<8x128xi32>
    %63 = arith.extui %62 : vector<8x128xi1> to vector<8x128xi32>
    %64 = arith.sitofp %63 : vector<8x128xi32> to vector<8x128xf32>
    %c3_i32_25 = arith.constant 3 : i32
    %65 = vector.broadcast %c3_i32_25 : i32 to vector<8x128xi32>
    %66 = arith.cmpi eq, %52, %65 : vector<8x128xi32>
    %67 = arith.extui %66 : vector<8x128xi1> to vector<8x128xi32>
    %68 = arith.sitofp %67 : vector<8x128xi32> to vector<8x128xf32>
    %c4_i32_26 = arith.constant 4 : i32
    %69 = vector.broadcast %c4_i32_26 : i32 to vector<8x128xi32>
    %70 = arith.cmpi eq, %52, %69 : vector<8x128xi32>
    %71 = arith.extui %70 : vector<8x128xi1> to vector<8x128xi32>
    %72 = arith.sitofp %71 : vector<8x128xi32> to vector<8x128xf32>
    %73 = tpu.concatenate %56, %60, %64, %68, %72 in 1 : vector<8x128xf32>, vector<8x128xf32>, vector<8x128xf32>, vector<8x128xf32>, vector<8x128xf32> -> vector<8x640xf32>
    %c1 = arith.constant 1 : index
    %c0_27 = arith.constant 0 : index
    %c0_28 = arith.constant 0 : index
    %74 = vector.load %arg5[%c1, %c0_27, %c0_28] : memref<3x8x128xf32, #tpu.memory_space<vmem>>, vector<1x8x128xf32>
    %75 = vector.shape_cast %74 : vector<1x8x128xf32> to vector<8x128xf32>
    %cst_29 = arith.constant dense<0.000000e+00> : vector<8x128xf32>
    %76 = tpu.matmul %73, %0, %cst_29 {dimension_numbers = #tpu.dot_dimension_numbers<[1], [0], [0], [1], [0, 0, 1, 1], [], []>} : vector<8x640xf32>, vector<640x128xf32>, vector<8x128xf32> -> vector<8x128xf32>
    %77 = vector.broadcast %3 : vector<1x128xf32> to vector<8x128xf32>
    %78 = arith.addf %76, %77 : vector<8x128xf32>
    %cst_30 = arith.constant 0.000000e+00 : f32
    %79 = vector.broadcast %cst_30 : f32 to vector<8x128xf32>
    %80 = arith.subf %79, %78 : vector<8x128xf32>
    %81 = math.exp %80 : vector<8x128xf32>
    %cst_31 = arith.constant 1.000000e+00 : f32
    %82 = vector.broadcast %cst_31 : f32 to vector<8x128xf32>
    %83 = arith.addf %82, %81 : vector<8x128xf32>
    %84 = tpu.reciprocal %83 {approx = true} : vector<8x128xf32> -> vector<8x128xf32>
    %85 = arith.cmpf olt, %75, %84 : vector<8x128xf32>
    %86 = arith.extui %85 : vector<8x128xi1> to vector<8x128xi32>
    %87 = arith.sitofp %86 : vector<8x128xi32> to vector<8x128xf32>
    %c1_32 = arith.constant 1 : index
    %c0_33 = arith.constant 0 : index
    %c0_34 = arith.constant 0 : index
    %88 = vector.load %arg6[%c1_32, %c0_33, %c0_34] : memref<2x8x640xf32, #tpu.memory_space<vmem>>, vector<1x8x640xf32>
    %89 = vector.shape_cast %88 : vector<1x8x640xf32> to vector<8x640xf32>
    %cst_35 = arith.constant dense<0.000000e+00> : vector<8x640xf32>
    %90 = tpu.matmul %87, %1, %cst_35 {dimension_numbers = #tpu.dot_dimension_numbers<[1], [0], [0], [1], [0, 0, 1, 1], [], []>} : vector<8x128xf32>, vector<128x640xf32>, vector<8x640xf32> -> vector<8x640xf32>
    %91 = vector.broadcast %2 : vector<1x640xf32> to vector<8x640xf32>
    %92 = arith.addf %90, %91 : vector<8x640xf32>
    %93 = math.log %89 : vector<8x640xf32>
    %cst_36 = arith.constant 0.000000e+00 : f32
    %94 = vector.broadcast %cst_36 : f32 to vector<8x640xf32>
    %95 = arith.subf %94, %93 : vector<8x640xf32>
    %96 = math.log %95 : vector<8x640xf32>
    %cst_37 = arith.constant 0.000000e+00 : f32
    %97 = vector.broadcast %cst_37 : f32 to vector<8x640xf32>
    %98 = arith.subf %97, %96 : vector<8x640xf32>
    %99 = arith.addf %92, %98 : vector<8x640xf32>
    %100 = vector.extract_strided_slice %99 {offsets = [0, 0], sizes = [8, 128], strides = [1, 1]} : vector<8x640xf32> to vector<8x128xf32>
    %c0_i32_38 = arith.constant 0 : i32
    %101 = vector.broadcast %c0_i32_38 : i32 to vector<8x128xi32>
    %102 = vector.extract_strided_slice %99 {offsets = [0, 128], sizes = [8, 128], strides = [1, 1]} : vector<8x640xf32> to vector<8x128xf32>
    %103 = arith.cmpf ogt, %102, %100 : vector<8x128xf32>
    %104 = arith.select %103, %102, %100 : vector<8x128xi1>, vector<8x128xf32>
    %c1_i32_39 = arith.constant 1 : i32
    %105 = vector.broadcast %c1_i32_39 : i32 to vector<8x128xi32>
    %106 = arith.select %103, %105, %101 : vector<8x128xi1>, vector<8x128xi32>
    %107 = vector.extract_strided_slice %99 {offsets = [0, 256], sizes = [8, 128], strides = [1, 1]} : vector<8x640xf32> to vector<8x128xf32>
    %108 = arith.cmpf ogt, %107, %104 : vector<8x128xf32>
    %109 = arith.select %108, %107, %104 : vector<8x128xi1>, vector<8x128xf32>
    %c2_i32_40 = arith.constant 2 : i32
    %110 = vector.broadcast %c2_i32_40 : i32 to vector<8x128xi32>
    %111 = arith.select %108, %110, %106 : vector<8x128xi1>, vector<8x128xi32>
    %112 = vector.extract_strided_slice %99 {offsets = [0, 384], sizes = [8, 128], strides = [1, 1]} : vector<8x640xf32> to vector<8x128xf32>
    %113 = arith.cmpf ogt, %112, %109 : vector<8x128xf32>
    %114 = arith.select %113, %112, %109 : vector<8x128xi1>, vector<8x128xf32>
    %c3_i32_41 = arith.constant 3 : i32
    %115 = vector.broadcast %c3_i32_41 : i32 to vector<8x128xi32>
    %116 = arith.select %113, %115, %111 : vector<8x128xi1>, vector<8x128xi32>
    %117 = vector.extract_strided_slice %99 {offsets = [0, 512], sizes = [8, 128], strides = [1, 1]} : vector<8x640xf32> to vector<8x128xf32>
    %118 = arith.cmpf ogt, %117, %114 : vector<8x128xf32>
    %c4_i32_42 = arith.constant 4 : i32
    %119 = vector.broadcast %c4_i32_42 : i32 to vector<8x128xi32>
    %120 = arith.select %118, %119, %116 : vector<8x128xi1>, vector<8x128xi32>
    %c0_i32_43 = arith.constant 0 : i32
    %121 = vector.broadcast %c0_i32_43 : i32 to vector<8x128xi32>
    %122 = arith.cmpi eq, %120, %121 : vector<8x128xi32>
    %123 = arith.extui %122 : vector<8x128xi1> to vector<8x128xi32>
    %124 = arith.sitofp %123 : vector<8x128xi32> to vector<8x128xf32>
    %c1_i32_44 = arith.constant 1 : i32
    %125 = vector.broadcast %c1_i32_44 : i32 to vector<8x128xi32>
    %126 = arith.cmpi eq, %120, %125 : vector<8x128xi32>
    %127 = arith.extui %126 : vector<8x128xi1> to vector<8x128xi32>
    %128 = arith.sitofp %127 : vector<8x128xi32> to vector<8x128xf32>
    %c2_i32_45 = arith.constant 2 : i32
    %129 = vector.broadcast %c2_i32_45 : i32 to vector<8x128xi32>
    %130 = arith.cmpi eq, %120, %129 : vector<8x128xi32>
    %131 = arith.extui %130 : vector<8x128xi1> to vector<8x128xi32>
    %132 = arith.sitofp %131 : vector<8x128xi32> to vector<8x128xf32>
    %c3_i32_46 = arith.constant 3 : i32
    %133 = vector.broadcast %c3_i32_46 : i32 to vector<8x128xi32>
    %134 = arith.cmpi eq, %120, %133 : vector<8x128xi32>
    %135 = arith.extui %134 : vector<8x128xi1> to vector<8x128xi32>
    %136 = arith.sitofp %135 : vector<8x128xi32> to vector<8x128xf32>
    %c4_i32_47 = arith.constant 4 : i32
    %137 = vector.broadcast %c4_i32_47 : i32 to vector<8x128xi32>
    %138 = arith.cmpi eq, %120, %137 : vector<8x128xi32>
    %139 = arith.extui %138 : vector<8x128xi1> to vector<8x128xi32>
    %140 = arith.sitofp %139 : vector<8x128xi32> to vector<8x128xf32>
    %141 = tpu.concatenate %124, %128, %132, %136, %140 in 1 : vector<8x128xf32>, vector<8x128xf32>, vector<8x128xf32>, vector<8x128xf32>, vector<8x128xf32> -> vector<8x640xf32>
    %c2 = arith.constant 2 : index
    %c0_48 = arith.constant 0 : index
    %c0_49 = arith.constant 0 : index
    %142 = vector.load %arg5[%c2, %c0_48, %c0_49] : memref<3x8x128xf32, #tpu.memory_space<vmem>>, vector<1x8x128xf32>
    %143 = vector.shape_cast %142 : vector<1x8x128xf32> to vector<8x128xf32>
    %cst_50 = arith.constant dense<0.000000e+00> : vector<8x128xf32>
    %144 = tpu.matmul %141, %0, %cst_50 {dimension_numbers = #tpu.dot_dimension_numbers<[1], [0], [0], [1], [0, 0, 1, 1], [], []>} : vector<8x640xf32>, vector<640x128xf32>, vector<8x128xf32> -> vector<8x128xf32>
    %145 = vector.broadcast %3 : vector<1x128xf32> to vector<8x128xf32>
    %146 = arith.addf %144, %145 : vector<8x128xf32>
    %cst_51 = arith.constant 0.000000e+00 : f32
    %147 = vector.broadcast %cst_51 : f32 to vector<8x128xf32>
    %148 = arith.subf %147, %146 : vector<8x128xf32>
    %149 = math.exp %148 : vector<8x128xf32>
    %cst_52 = arith.constant 1.000000e+00 : f32
    %150 = vector.broadcast %cst_52 : f32 to vector<8x128xf32>
    %151 = arith.addf %150, %149 : vector<8x128xf32>
    %152 = tpu.reciprocal %151 {approx = true} : vector<8x128xf32> -> vector<8x128xf32>
    %153 = arith.cmpf olt, %143, %152 : vector<8x128xf32>
    %154 = arith.extui %153 : vector<8x128xi1> to vector<8x128xi32>
    %155 = arith.sitofp %154 : vector<8x128xi32> to vector<8x128xf32>
    %c0_53 = arith.constant 0 : index
    %c0_54 = arith.constant 0 : index
    %156 = vector.load %arg7[%c0_53, %c0_54] : memref<8x640xf32, #tpu.memory_space<vmem>>, vector<8x640xf32>
    tpu.vector_store %arg7[%c0_53, %c0_54], %141 {strides = array<i32>} : memref<8x640xf32, #tpu.memory_space<vmem>>, vector<8x640xf32>,
    %c0_55 = arith.constant 0 : index
    %c0_56 = arith.constant 0 : index
    %157 = vector.load %arg8[%c0_55, %c0_56] : memref<8x128xf32, #tpu.memory_space<vmem>>, vector<8x128xf32>
    tpu.vector_store %arg8[%c0_55, %c0_56], %155 {strides = array<i32>} : memref<8x128xf32, #tpu.memory_space<vmem>>, vector<8x128xf32>,
    return
  }
}

</mosaic_0001>

<bundles_post_ra>
// kernel: rbm_forward.1
= control target key start
LH: loop header
LB: loop body
LE: loop exit
PB: predicated region body
PF: predicated region fallthrough
CT: control target
= control target key end

     0   :  { %vm2468_vm0 = vmmov 0   ;;  %s3570_s1 = inlined_call_operand.vmem [shape: f32[640,128], index: 1, kind: input, shape index: {}]   ;;  %s3571_s0 = inlined_call_operand.vmem [shape: f32[8,640], index: 0, kind: input, shape index: {}]   ;;  %s3572_s2 = inlined_call_operand.vmem [shape: f32[128,640], index: 2, kind: input, shape index: {}]   ;;  %s3573_s4 = inlined_call_operand.vmem [shape: f32[1,128], index: 4, kind: input, shape index: {}]   ;;  %s3574_s5 = inlined_call_operand.vmem [shape: f32[3,8,128], index: 5, kind: input, shape index: {}]   ;;  %s3575_s9 = inlined_call_operand.vmem [shape: f32[8,128], index: 9, kind: output, shape index: {2}]   ;;  %s3576_s6 = inlined_call_operand.vmem [shape: f32[2,8,640], index: 6, kind: input, shape index: {}]   ;;  %s3577_s3 = inlined_call_operand.vmem [shape: f32[1,640], index: 3, kind: input, shape index: {}]   ;;  %s3578_s7 = inlined_call_operand.vmem [shape: f32[8,640], index: 7, kind: output, shape index: {0}]   ;;  %s3579_s8 = inlined_call_operand.vmem [shape: f32[8,128], index: 8, kind: output, shape index: {1}]  }
   0x1   :  { %v45_v0 = vld [vmem:[%s3570_s1 + $0x80] sm:$0xff]  ;;  %v46_v1 = vld [vmem:[%s3570_s1 + $0x88] sm:$0xff]  ;;  %v47_v11 = vld [vmem:[%s3570_s1 + $0x90] sm:$0xff] }
   0x2   :  { %v29_v2 = vld [vmem:[%s3570_s1] sm:$0xff]  ;;  %v2531_v3 = vpack.c.bf16 %v46_v1, %v45_v0  ;;  %v30_v4 = vld [vmem:[%s3570_s1 + $0x8] sm:$0xff]  ;;  %v48_v13 = vld [vmem:[%s3570_s1 + $0x98] sm:$0xff] }
   0x3   :  { %v77_v5 = vld [vmem:[%s3570_s1 + $0x180] sm:$0xff]  ;;  %v78_v6 = vld [vmem:[%s3570_s1 + $0x188] sm:$0xff]  ;;  %v2542_v7 = vpack.c.bf16 %v30_v4, %v29_v2  ;;  %v31_v14 = vld [vmem:[%s3570_s1 + $0x10] sm:$0xff]  ;;  %v2569_v16 = vpack.c.bf16 %v48_v13, %v47_v11 }
   0x4   :  { %3637 = vst [vmem:[#allocation2_spill] sm:$0xff] %v2531_v3  ;;  %v2544_v8 = vpack.c.bf16 %v78_v6, %v77_v5  ;;  %v61_v9 = vld [vmem:[%s3570_s1 + $0x100] sm:$0xff]  ;;  %v62_v10 = vld [vmem:[%s3570_s1 + $0x108] sm:$0xff]  ;;  %1971 = vmatprep.subr.bf16.mxu0 %v2531_v3  ;;  %v32_v15 = vld [vmem:[%s3570_s1 + $0x18] sm:$0xff] }
   0x5   :  { %v2556_v12 = vpack.c.bf16 %v62_v10, %v61_v9  ;;  %1973 = vmatpush3.bf16.msra.mxu0 %v2542_v7  ;;  %v2571_v17 = vpack.c.bf16 %v32_v15, %v31_v14  ;;  %v79_v18 = vld [vmem:[%s3570_s1 + $0x190] sm:$0xff]  ;;  %v80_v19 = vld [vmem:[%s3570_s1 + $0x198] sm:$0xff]  ;;  %v49_v23 = vld [vmem:[%s3570_s1 + $0xa0] sm:$0xff] }
   0x6   :  { %3638 = vst [vmem:[#allocation3_spill] sm:$0xff] %v2544_v8  ;;  %2003 = vmatprep.subr.bf16.mxu1 %v2544_v8  ;;  %v63_v20 = vld [vmem:[%s3570_s1 + $0x110] sm:$0xff]  ;;  %v2583_v21 = vpack.c.bf16 %v80_v19, %v79_v18  ;;  %v64_v22 = vld [vmem:[%s3570_s1 + $0x118] sm:$0xff]  ;;  %v50_v24 = vld [vmem:[%s3570_s1 + $0xa8] sm:$0xff]  ;;  %1975 = vmatprep.subr.bf16.mxu0 %v2569_v16 }
   0x7   :  { %3639 = vst [vmem:[#allocation4_spill] sm:$0xff] %v2556_v12  ;;  %2005 = vmatpush3.bf16.msra.mxu1 %v2556_v12  ;;  %v2595_v25 = vpack.c.bf16 %v64_v22, %v63_v20  ;;  %v2597_v26 = vpack.c.bf16 %v50_v24, %v49_v23  ;;  %v33_v27 = vld [vmem:[%s3570_s1 + $0x20] sm:$0xff]  ;;  %v34_v28 = vld [vmem:[%s3570_s1 + $0x28] sm:$0xff]  ;;  %v51_v35 = vld [vmem:[%s3570_s1 + $0xb0] sm:$0xff] }
   0x8   :  { %3640 = vst [vmem:[#allocation5_spill] sm:$0xff] %v2583_v21  ;;  %v81_v29 = vld [vmem:[%s3570_s1 + $0x1a0] sm:$0xff]  ;;  %2007 = vmatprep.subr.bf16.mxu1 %v2583_v21  ;;  %v82_v30 = vld [vmem:[%s3570_s1 + $0x1a8] sm:$0xff]  ;;  %v2619_v33 = vpack.c.bf16 %v34_v28, %v33_v27  ;;  %v52_v36 = vld [vmem:[%s3570_s1 + $0xb8] sm:$0xff] }
   0x9   :  { %3641 = vst [vmem:[#allocation6_spill] sm:$0xff] %v2595_v25  ;;  %v65_v31 = vld [vmem:[%s3570_s1 + $0x120] sm:$0xff]  ;;  %v66_v32 = vld [vmem:[%s3570_s1 + $0x128] sm:$0xff]  ;;  %1977 = vmatpush3.bf16.msra.mxu0 %v2571_v17  ;;  %v2621_v34 = vpack.c.bf16 %v82_v30, %v81_v29  ;;  %v35_v37 = vld [vmem:[%s3570_s1 + $0x30] sm:$0xff]  ;;  %v2636_v39 = vpack.c.bf16 %v52_v36, %v51_v35 }
   0xa   :  { %1979 = vmatprep.subr.bf16.mxu0 %v2597_v26  ;;  %v2634_v38 = vpack.c.bf16 %v66_v32, %v65_v31  ;;  %v36_v40 = vld [vmem:[%s3570_s1 + $0x38] sm:$0xff]  ;;  %v83_v41 = vld [vmem:[%s3570_s1 + $0x1b0] sm:$0xff]  ;;  %v53_v46 = vld [vmem:[%s3570_s1 + $0xc0] sm:$0xff] }
   0xb   :  { %3642 = vst [vmem:[#allocation7_spill] sm:$0xff] %v2621_v34  ;;  %2009 = vmatpush3.bf16.msra.mxu1 %v2595_v25  ;;  %v84_v42 = vld [vmem:[%s3570_s1 + $0x1b8] sm:$0xff]  ;;  %v67_v44 = vld [vmem:[%s3570_s1 + $0x130] sm:$0xff]  ;;  %v54_v47 = vld [vmem:[%s3570_s1 + $0xc8] sm:$0xff]  ;;  %v2663_v48 = vpack.c.bf16 %v36_v40, %v35_v37 }
   0xc   :  { %3643 = vst [vmem:[#allocation8_spill] sm:$0xff] %v2634_v38  ;;  %2011 = vmatprep.subr.bf16.mxu1 %v2621_v34  ;;  %v2648_v43 = vpack.c.bf16 %v84_v42, %v83_v41  ;;  %v68_v45 = vld [vmem:[%s3570_s1 + $0x138] sm:$0xff]  ;;  %v85_v49 = vld [vmem:[%s3570_s1 + $0x1c0] sm:$0xff]  ;;  %v86_v50 = vld [vmem:[%s3570_s1 + $0x1c8] sm:$0xff]  ;;  %v2675_v52 = vpack.c.bf16 %v54_v47, %v53_v46 }
   0xd   :  { %1981 = vmatpush3.bf16.msra.mxu0 %v2619_v33  ;;  %v2673_v51 = vpack.c.bf16 %v68_v45, %v67_v44  ;;  %v37_v53 = vld [vmem:[%s3570_s1 + $0x40] sm:$0xff]  ;;  %v38_v54 = vld [vmem:[%s3570_s1 + $0x48] sm:$0xff]  ;;  %v2687_v56 = vpack.c.bf16 %v86_v50, %v85_v49  ;;  %v55_v58 = vld [vmem:[%s3570_s1 + $0xd0] sm:$0xff] }
   0xe   :  { %3644 = vst [vmem:[#allocation9_spill] sm:$0xff] %v2648_v43  ;;  %1983 = vmatprep.subr.bf16.mxu0 %v2636_v39  ;;  %v69_v55 = vld [vmem:[%s3570_s1 + $0x140] sm:$0xff]  ;;  %v70_v57 = vld [vmem:[%s3570_s1 + $0x148] sm:$0xff]  ;;  %v56_v59 = vld [vmem:[%s3570_s1 + $0xd8] sm:$0xff]  ;;  %v2705_v62 = vpack.c.bf16 %v38_v54, %v37_v53 }
   0xf   :  { %2013 = vmatpush3.bf16.msra.mxu1 %v2634_v38  ;;  %3645 = vst [vmem:[#allocation10_spill] sm:$0xff] %v2673_v51  ;;  %3646 = vst [vmem:[#allocation11_spill] sm:$0xff] %v2687_v56  ;;  %v87_v60 = vld [vmem:[%s3570_s1 + $0x1d0] sm:$0xff]  ;;  %v88_v61 = vld [vmem:[%s3570_s1 + $0x1d8] sm:$0xff]  ;;  %v2709_v63 = vpack.c.bf16 %v70_v57, %v69_v55  ;;  %v2711_v0 = vpack.c.bf16 %v56_v59, %v55_v58  ;;  %v3582_v55 = vmov 0.0|0.0  }
  0x10   :  { %2015 = vmatprep.subr.bf16.mxu1 %v2648_v43  ;;  %v39_v1 = vld [vmem:[%s3570_s1 + $0x50] sm:$0xff]  ;;  %v40_v2 = vld [vmem:[%s3570_s1 + $0x58] sm:$0xff]  ;;  %v2723_v5 = vpack.c.bf16 %v88_v61, %v87_v60  ;;  %v57_v9 = vld [vmem:[%s3570_s1 + $0xe0] sm:$0xff] }
  0x11   :  { %1985 = vmatpush3.bf16.msra.mxu0 %v2663_v48  ;;  %3647 = vst [vmem:[#allocation12_spill] sm:$0xff] %v2709_v63  ;;  %v71_v4 = vld [vmem:[%s3570_s1 + $0x150] sm:$0xff]  ;;  %v72_v6 = vld [vmem:[%s3570_s1 + $0x158] sm:$0xff]  ;;  %v58_v10 = vld [vmem:[%s3570_s1 + $0xe8] sm:$0xff]  ;;  %v2741_v14 = vpack.c.bf16 %v40_v2, %v39_v1  ;;  %v3580_v2 = vmov 0.0  }
  0x12   :  { %1987 = vmatprep.subr.bf16.mxu0 %v2675_v52  ;;  %3648 = vst [vmem:[#allocation13_spill] sm:$0xff] %v2723_v5  ;;  %v89_v11 = vld [vmem:[%s3570_s1 + $0x1e0] sm:$0xff]  ;;  %v90_v13 = vld [vmem:[%s3570_s1 + $0x1e8] sm:$0xff]  ;;  %v2751_v19 = vpack.c.bf16 %v72_v6, %v71_v4  ;;  %v2753_v20 = vpack.c.bf16 %v58_v10, %v57_v9  ;;  %v59_v28 = vld [vmem:[%s3570_s1 + $0xf0] sm:$0xff] }
  0x13   :  { %2017 = vmatpush3.bf16.msra.mxu1 %v2673_v51  ;;  %v41_v15 = vld [vmem:[%s3570_s1 + $0x60] sm:$0xff]  ;;  %v192_v18 = vld [vmem:[%s3571_s0 + $0x8] sm:$0xff]  ;;  %v2765_v27 = vpack.c.bf16 %v90_v13, %v89_v11  ;;  %v60_v29 = vld [vmem:[%s3570_s1 + $0xf8] sm:$0xff] }
  0x14   :  { %2019 = vmatprep.subr.bf16.mxu1 %v2687_v56  ;;  %3649 = vst [vmem:[#allocation14_spill] sm:$0xff] %v2751_v19  ;;  %v42_v22 = vld [vmem:[%s3570_s1 + $0x68] sm:$0xff]  ;;  %v73_v23 = vld [vmem:[%s3570_s1 + $0x160] sm:$0xff]  ;;  %267 = vmatprep.mubr.f32.mxu0 %v192_v18  ;;  %v194_v30 = vld [vmem:[%s3571_s0 + $0x18] sm:$0xff]  ;;  %v2789_v37 = vpack.c.bf16 %v60_v29, %v59_v28 }
  0x15   :  { %1989 = vmatpush3.bf16.msra.mxu0 %v2705_v62  ;;  %v74_v24 = vld [vmem:[%s3570_s1 + $0x168] sm:$0xff]  ;;  %3650 = vst [vmem:[#allocation15_spill] sm:$0xff] %v2765_v27  ;;  %v91_v31 = vld [vmem:[%s3570_s1 + $0x1f0] sm:$0xff]  ;;  %v92_v32 = vld [vmem:[%s3570_s1 + $0x1f8] sm:$0xff]  ;;  %337 = vmatprep.mubr.f32.mxu1 %v194_v30  ;;  %v2783_v35 = vpack.c.bf16 %v42_v22, %v41_v15 }
  0x16   :  { %1991 = vmatprep.subr.bf16.mxu0 %v2711_v0  ;;  %v2787_v36 = vpack.c.bf16 %v74_v24, %v73_v23  ;;  %3653 = vst [vmem:[#allocation18_spill] sm:$0xff] %v2789_v37  ;;  %v43_v40 = vld [vmem:[%s3570_s1 + $0x70] sm:$0xff]  ;;  %v44_v41 = vld [vmem:[%s3570_s1 + $0x78] sm:$0xff]  ;;  %v2798_v42 = vpack.c.bf16 %v92_v32, %v91_v31  ;;  %v93_v49 = vld [vmem:[%s3570_s1 + $0x200] sm:$0xff] }
  0x17   :  { %2021 = vmatpush3.bf16.msra.mxu1 %v2709_v63  ;;  %3651 = vst [vmem:[#allocation16_spill] sm:$0xff] %v2783_v35  ;;  %v75_v44 = vld [vmem:[%s3570_s1 + $0x170] sm:$0xff]  ;;  %v76_v45 = vld [vmem:[%s3570_s1 + $0x178] sm:$0xff]  ;;  %v2807_v46 = vpack.c.bf16 %v44_v41, %v43_v40  ;;  %v94_v50 = vld [vmem:[%s3570_s1 + $0x208] sm:$0xff] }
  0x18   :  { %2023 = vmatprep.subr.bf16.mxu1 %v2723_v5  ;;  %3652 = vst [vmem:[#allocation17_spill] sm:$0xff] %v2787_v36  ;;  %3654 = vst [vmem:[#allocation19_spill] sm:$0xff] %v2798_v42  ;;  %v2811_v47 = vpack.c.bf16 %v76_v45, %v75_v44  ;;  %v191_v53 = vld [vmem:[%s3571_s0] sm:$0xff]  ;;  %v2824_v54 = vpack.c.bf16 %v94_v50, %v93_v49  ;;  %v193_v57 = vld [vmem:[%s3571_s0 + $0x10] sm:$0xff] }
  0x19   :  { %1993 = vmatpush3.bf16.msra.mxu0 %v2741_v14  ;;  %3655 = vst [vmem:[#allocation20_spill] sm:$0xff] %v2807_v46  ;;  %v95_v58 = vld [vmem:[%s3570_s1 + $0x210] sm:$0xff]  ;;  %v96_v59 = vld [vmem:[%s3570_s1 + $0x218] sm:$0xff]  ;;  %v97_v61 = vld [vmem:[%s3570_s1 + $0x220] sm:$0xff] }
  0x1a   :  { %1995 = vmatprep.subr.bf16.mxu0 %v2753_v20  ;;  %3656 = vst [vmem:[#allocation21_spill] sm:$0xff] %v2811_v47  ;;  %v2838_v60 = vpack.c.bf16 %v96_v59, %v95_v58  ;;  %v98_v1 = vld [vmem:[%s3570_s1 + $0x228] sm:$0xff]  ;;  %v99_v6 = vld [vmem:[%s3570_s1 + $0x230] sm:$0xff]  ;;  %v100_v9 = vld [vmem:[%s3570_s1 + $0x238] sm:$0xff] }
  0x1b   :  { %2025 = vmatpush3.bf16.msra.mxu1 %v2751_v19  ;;  %v2851_v4 = vpack.c.bf16 %v98_v1, %v97_v61  ;;  %v2861_v10 = vpack.c.bf16 %v100_v9, %v99_v6  ;;  %v101_v11 = vld [vmem:[%s3570_s1 + $0x240] sm:$0xff]  ;;  %v102_v13 = vld [vmem:[%s3570_s1 + $0x248] sm:$0xff]  ;;  %v103_v18 = vld [vmem:[%s3570_s1 + $0x250] sm:$0xff] }
  0x1c   :  { %2027 = vmatprep.subr.bf16.mxu1 %v2765_v27  ;;  %v2871_v15 = vpack.c.bf16 %v102_v13, %v101_v11  ;;  %v104_v22 = vld [vmem:[%s3570_s1 + $0x258] sm:$0xff]  ;;  %v105_v24 = vld [vmem:[%s3570_s1 + $0x260] sm:$0xff]  ;;  %v106_v28 = vld [vmem:[%s3570_s1 + $0x268] sm:$0xff] }
  0x1d   :  { %1997 = vmatpush3.bf16.msra.mxu0 %v2783_v35  ;;  %v2881_v23 = vpack.c.bf16 %v104_v22, %v103_v18  ;;  %v2891_v29 = vpack.c.bf16 %v106_v28, %v105_v24  ;;  %v107_v30 = vld [vmem:[%s3570_s1 + $0x270] sm:$0xff]  ;;  %v108_v31 = vld [vmem:[%s3570_s1 + $0x278] sm:$0xff]  ;;  %v195_v40 = vld [vmem:[%s3571_s0 + $0x20] sm:$0xff] }
  0x1e   :  { %1999 = vmatprep.subr.bf16.mxu0 %v2789_v37  ;;  %v2901_v32 = vpack.c.bf16 %v108_v31, %v107_v30  ;;  %v110_v41 = vld [vmem:[%s3572_s2 + $0x8] sm:$0xff]  ;;  %v115_v44 = vld [vmem:[%s3572_s2 + $0x30] sm:$0xff]  ;;  %v109_v49 = vld [vmem:[%s3572_s2] sm:$0xff] }
  0x1f   :  { %2029 = vmatpush3.bf16.msra.mxu1 %v2787_v36  ;;  %3657 = vst [vmem:[#allocation22_spill] sm:$0xff] %v2881_v23  ;;  %3658 = vst [vmem:[#allocation23_spill] sm:$0xff] %v2891_v29  ;;  %v2915_v45 = vpack.c.bf16 %v115_v44, %v110_v41  ;;  %v114_v50 = vld [vmem:[%s3572_s2 + $0x28] sm:$0xff]  ;;  %v117_v58 = vld [vmem:[%s3572_s2 + $0x40] sm:$0xff] }
  0x20   :  { %2031 = vmatprep.subr.bf16.mxu1 %v2798_v42  ;;  %3659 = vst [vmem:[#allocation24_spill] sm:$0xff] %v2901_v32  ;;  %v111_v59 = vld [vmem:[%s3572_s2 + $0x10] sm:$0xff]  ;;  %v116_v61 = vld [vmem:[%s3572_s2 + $0x38] sm:$0xff]  ;;  %v125_v11 = vld [vmem:[%s3572_s2 + $0x80] sm:$0xff] }
  0x21   :  { %2001 = vmatpush3.bf16.msra.mxu0 %v2807_v46  ;;  %v2940_v6 = vpack.c.bf16 %v116_v61, %v111_v59  ;;  %v120_v9 = vld [vmem:[%s3572_s2 + $0x58] sm:$0xff]  ;;  %v119_v18 = vld [vmem:[%s3572_s2 + $0x50] sm:$0xff]  ;;  %v122_v24 = vld [vmem:[%s3572_s2 + $0x68] sm:$0xff] }
  0x22   :  { %2034 = vmatprep.subr.bf16.mxu0 %v3582_v55  ;;  %v2950_v13 = vpack.c.bf16 %v125_v11, %v120_v9  ;;  %v124_v22 = vld [vmem:[%s3572_s2 + $0x78] sm:$0xff]  ;;  %v127_v30 = vld [vmem:[%s3572_s2 + $0x90] sm:$0xff]  ;;  %v121_v31 = vld [vmem:[%s3572_s2 + $0x60] sm:$0xff] }
  0x23   :  { %2033 = vmatpush3.bf16.msra.mxu1 %v2811_v47  ;;  %3661 = vst [vmem:[#allocation26_spill] sm:$0xff] %v2940_v6  ;;  %v2962_v28 = vpack.c.bf16 %v124_v22, %v119_v18  ;;  %v2974_v41 = vpack.c.bf16 %v127_v30, %v122_v24  ;;  %v134_v59 = vld [vmem:[%s3572_s2 + $0xc8] sm:$0xff]  ;;  %v132_v61 = vld [vmem:[%s3572_s2 + $0xb8] sm:$0xff]  ;;  %v137_v11 = vld [vmem:[%s3572_s2 + $0xe0] sm:$0xff] }
  0x24   :  { %268 = vmatmul.mubr.f32.vlgmr.msra.gmra.mrb[0].mxu0 %v191_v53  ;;  %2059 = vmatprep.subr.bf16.mxu1 %v2915_v45  ;;  %v112_v53 = vld [vmem:[%s3572_s2 + $0x18] sm:$0xff]  ;;  %v131_v18 = vld [vmem:[%s3572_s2 + $0xb0] sm:$0xff]  ;;  %v3010_v24 = vpack.c.bf16 %v137_v11, %v132_v61 }
  0x25   :  { %2036 = vmatpush3.bf16.msra.mxu0 %v2824_v54  ;;  %1827 = vmatprep.mubr.msk.f32.mxu0 %vm2468_vm0, %v3580_v2  ;;  %v2938_v1 = vpack.c.bf16 %v117_v58, %v112_v53  ;;  %3662 = vst [vmem:[#allocation27_spill] sm:$0xff] %v2974_v41  ;;  %v129_v58 = vld [vmem:[%s3572_s2 + $0xa0] sm:$0xff]  ;;  %v136_v22 = vld [vmem:[%s3572_s2 + $0xd8] sm:$0xff]  ;;  %v147_v11 = vld [vmem:[%s3572_s2 + $0x130] sm:$0xff] }
  0x26   :  { %338 = vmatmul.mubr.f32.vlgmr.msra.gmra.mrb[0].mxu1 %v193_v57  ;;  %2037 = vmatprep.subr.bf16.mxu0 %v3582_v55  ;;  %v2927_v57 = vpack.c.bf16 %v114_v50, %v109_v49  ;;  %v130_v49 = vld [vmem:[%s3572_s2 + $0xa8] sm:$0xff]  ;;  %v135_v50 = vld [vmem:[%s3572_s2 + $0xd0] sm:$0xff]  ;;  %v2998_v9 = vpack.c.bf16 %v134_v59, %v129_v58  ;;  %3664 = vst [vmem:[#allocation29_spill] sm:$0xff] %v3010_v24  ;;  %v144_v58 = vld [vmem:[%s3572_s2 + $0x118] sm:$0xff] }
  0x27   :  { %517 = vmatprep.mubr.f32.mxu1 %v3580_v2  ;;  %3660 = vst [vmem:[#allocation25_spill] sm:$0xff] %v2938_v1  ;;  %v2986_v53 = vpack.c.bf16 %v135_v50, %v130_v49  ;;  %v3012_v30 = vpack.c.bf16 %v136_v22, %v131_v18  ;;  %v139_v50 = vld [vmem:[%s3572_s2 + $0xf0] sm:$0xff]  ;;  %v142_v59 = vld [vmem:[%s3572_s2 + $0x108] sm:$0xff]  ;;  %v141_v18 = vld [vmem:[%s3572_s2 + $0x100] sm:$0xff] }
  0x28   :  { %2061 = vmatpush1.bf16.msra.mxu1 %v2927_v57  ;;  %v3034_v61 = vpack.c.bf16 %v144_v58, %v139_v50  ;;  %v146_v22 = vld [vmem:[%s3572_s2 + $0x128] sm:$0xff]  ;;  %v155_v58 = vld [vmem:[%s3572_s2 + $0x170] sm:$0xff] }
  0x29   :  { %2039 = vmatpush3.bf16.msra.mxu0 %v2838_v60  ;;  %2063 = vmatprep.subr.bf16.mxu1 %v2950_v13  ;;  %3665 = vst [vmem:[#allocation30_spill] sm:$0xff] %v3012_v30  ;;  %v150_v50 = vld [vmem:[%s3572_s2 + $0x148] sm:$0xff] }
  0x2a   :  { %2040 = vmatprep.subr.bf16.mxu0 %v3582_v55 }
  0x2c   :  { %2065 = vmatpush1.bf16.msra.mxu1 %v2962_v28 }
  0x2d   :  { %2042 = vmatpush3.bf16.msra.mxu0 %v2851_v4  ;;  %2067 = vmatprep.subr.bf16.mxu1 %v2986_v53 }
  0x2e   :  { %2043 = vmatprep.subr.bf16.mxu0 %v3582_v55 }
  0x30   :  { %2069 = vmatpush1.bf16.msra.mxu1 %v2998_v9 }
  0x31   :  { %2045 = vmatpush3.bf16.msra.mxu0 %v2861_v10 }
  0x32   :  { %2046 = vmatprep.subr.bf16.mxu0 %v3582_v55 }
  0x35   :  { %2048 = vmatpush3.bf16.msra.mxu0 %v2871_v15 }
  0x36   :  { %2049 = vmatprep.subr.bf16.mxu0 %v3582_v55 }
  0x39   :  { %2051 = vmatpush3.bf16.msra.mxu0 %v2881_v23 }
  0x3a   :  { %2052 = vmatprep.subr.bf16.mxu0 %v3582_v55 }
  0x3d   :  { %2054 = vmatpush3.bf16.msra.mxu0 %v2891_v29 }
  0x3e   :  { %2055 = vmatprep.subr.bf16.mxu0 %v3582_v55  ;;  %v156_v55 = vld [vmem:[%s3572_s2 + $0x178] sm:$0xff] }
  0x41   :  { %2057 = vmatpush3.bf16.msra.mxu0 %v2901_v32  ;;  %v181_v32 = vld [vmem:[%s3572_s2 + $0x240] sm:$0xff] }
  0x42   :  { %2091 = vmatprep.subr.bf16.mxu0 %v2938_v1 }
  0x44   :  { %1828 = vmatmul.mubr.f32.vlgmr.msra.gmra.mrb[2].mxu0 %v195_v40  ;;  %v126_v40 = vld [vmem:[%s3572_s2 + $0x88] sm:$0xff] }
  0x45   :  { %588 = vmatprep.mubr.f32.mxu0 %v3580_v2  ;;  %2093 = vmatpush1.bf16.msra.mxu0 %v2940_v6  ;;  %v2976_v44 = vpack.c.bf16 %v126_v40, %v121_v31  ;;  %v140_v31 = vld [vmem:[%s3572_s2 + $0xf8] sm:$0xff]  ;;  %v145_v40 = vld [vmem:[%s3572_s2 + $0x120] sm:$0xff]  ;;  %v3058_v2 = vpack.c.bf16 %v155_v58, %v150_v50  ;;  %v151_v58 = vld [vmem:[%s3572_s2 + $0x150] sm:$0xff] }
  0x46   :  { %2095 = vmatprep.subr.bf16.mxu0 %v2974_v41  ;;  %v3022_v49 = vpack.c.bf16 %v145_v40, %v140_v31  ;;  %v3046_v31 = vpack.c.bf16 %v147_v11, %v142_v59  ;;  %v3048_v40 = vpack.c.bf16 %v146_v22, %v141_v18  ;;  %v149_v59 = vld [vmem:[%s3572_s2 + $0x140] sm:$0xff]  ;;  %v154_v11 = vld [vmem:[%s3572_s2 + $0x168] sm:$0xff]  ;;  %v152_v18 = vld [vmem:[%s3572_s2 + $0x158] sm:$0xff] }
  0x47   :  { %3663 = vst [vmem:[#allocation28_spill] sm:$0xff] %v2976_v44  ;;  %v3070_v22 = vpack.c.bf16 %v154_v11, %v149_v59  ;;  %v157_v50 = vld [vmem:[%s3572_s2 + $0x180] sm:$0xff]  ;;  %v160_v59 = vld [vmem:[%s3572_s2 + $0x198] sm:$0xff] }
  0x48   :  { %2071 = vmatprep.subr.bf16.mxu1 %v3022_v49  ;;  %3666 = vst [vmem:[#allocation31_spill] sm:$0xff] %v3046_v31  ;;  %3667 = vst [vmem:[#allocation32_spill] sm:$0xff] %v3048_v40  ;;  %v165_v11 = vld [vmem:[%s3572_s2 + $0x1c0] sm:$0xff] }
  0x49   :  { %2097 = vmatpush1.bf16.msra.mxu0 %v2976_v44  ;;  %2073 = vmatpush1.bf16.msra.mxu1 %v3034_v61 }
  0x4a   :  { %2099 = vmatprep.subr.bf16.mxu0 %v3010_v24  ;;  %2075 = vmatprep.subr.bf16.mxu1 %v3058_v2 }
  0x4d   :  { %2101 = vmatpush1.bf16.msra.mxu0 %v3012_v30  ;;  %v3084_v30 = vpack.c.bf16 %v156_v55, %v151_v58  ;;  %2077 = vmatpush1.bf16.msra.mxu1 %v3070_v22  ;;  %v164_v55 = vld [vmem:[%s3572_s2 + $0x1b8] sm:$0xff] }
  0x4e   :  { %2103 = vmatprep.subr.bf16.mxu0 %v3046_v31  ;;  %v3082_v31 = vpack.c.bf16 %v157_v50, %v152_v18  ;;  %v159_v18 = vld [vmem:[%s3572_s2 + $0x190] sm:$0xff]  ;;  %v162_v50 = vld [vmem:[%s3572_s2 + $0x1a8] sm:$0xff] }
  0x4f   :  { %3669 = vst [vmem:[#allocation34_spill] sm:$0xff] %v3084_v30  ;;  %v3106_v58 = vpack.c.bf16 %v164_v55, %v159_v18  ;;  %v170_v18 = vld [vmem:[%s3572_s2 + $0x1e8] sm:$0xff]  ;;  %v175_v55 = vld [vmem:[%s3572_s2 + $0x210] sm:$0xff] }
  0x50   :  { %3668 = vst [vmem:[#allocation33_spill] sm:$0xff] %v3082_v31 }
  0x51   :  { %2105 = vmatpush1.bf16.msra.mxu0 %v3048_v40  ;;  %v3094_v40 = vpack.c.bf16 %v165_v11, %v160_v59  ;;  %3671 = vst [vmem:[#allocation36_spill] sm:$0xff] %v3106_v58  ;;  %v167_v59 = vld [vmem:[%s3572_s2 + $0x1d0] sm:$0xff]  ;;  %v161_v11 = vld [vmem:[%s3572_s2 + $0x1a0] sm:$0xff] }
  0x52   :  { %2107 = vmatprep.subr.bf16.mxu0 %v3082_v31  ;;  %v166_v31 = vld [vmem:[%s3572_s2 + $0x1c8] sm:$0xff]  ;;  %v3118_v24 = vpack.c.bf16 %v167_v59, %v162_v50  ;;  %v3133_v50 = vpack.c.bf16 %v175_v55, %v170_v18  ;;  %v172_v59 = vld [vmem:[%s3572_s2 + $0x1f8] sm:$0xff]  ;;  %v171_v18 = vld [vmem:[%s3572_s2 + $0x1f0] sm:$0xff] }
  0x53   :  { %3670 = vst [vmem:[#allocation35_spill] sm:$0xff] %v3094_v40  ;;  %2079 = vmatprep.subr.bf16.mxu1 %v3094_v40  ;;  %v3120_v44 = vpack.c.bf16 %v166_v31, %v161_v11  ;;  %v174_v31 = vld [vmem:[%s3572_s2 + $0x208] sm:$0xff]  ;;  %v177_v11 = vld [vmem:[%s3572_s2 + $0x220] sm:$0xff]  ;;  %v176_v55 = vld [vmem:[%s3572_s2 + $0x218] sm:$0xff] }
  0x54   :  { %3672 = vst [vmem:[#allocation37_spill] sm:$0xff] %v3118_v24  ;;  %2081 = vmatpush1.bf16.msra.mxu1 %v3106_v58  ;;  %3674 = vst [vmem:[#allocation39_spill] sm:$0xff] %v3133_v50  ;;  %v3147_v6 = vpack.c.bf16 %v177_v11, %v172_v59  ;;  %v3159_v1 = vpack.c.bf16 %v176_v55, %v171_v18  ;;  %v184_v59 = vld [vmem:[%s3572_s2 + $0x258] sm:$0xff]  ;;  %v182_v55 = vld [vmem:[%s3572_s2 + $0x248] sm:$0xff] }
  0x55   :  { %2109 = vmatpush1.bf16.msra.mxu0 %v3084_v30  ;;  %3673 = vst [vmem:[#allocation38_spill] sm:$0xff] %v3120_v44  ;;  %v169_v30 = vld [vmem:[%s3572_s2 + $0x1e0] sm:$0xff]  ;;  %2083 = vmatprep.subr.bf16.mxu1 %v3133_v50 }
  0x56   :  { %2111 = vmatprep.subr.bf16.mxu0 %v3118_v24  ;;  %v3145_v41 = vpack.c.bf16 %v174_v31, %v169_v30  ;;  %3676 = vst [vmem:[#allocation41_spill] sm:$0xff] %v3147_v6  ;;  %v180_v24 = vld [vmem:[%s3572_s2 + $0x238] sm:$0xff]  ;;  %3677 = vst [vmem:[#allocation42_spill] sm:$0xff] %v3159_v1  ;;  %v185_v30 = vld [vmem:[%s3572_s2 + $0x260] sm:$0xff] }
  0x57   :  { %v179_v31 = vld [vmem:[%s3572_s2 + $0x230] sm:$0xff]  ;;  %v3172_v11 = vpack.c.bf16 %v185_v30, %v180_v24  ;;  %v186_v24 = vld [vmem:[%s3572_s2 + $0x268] sm:$0xff]  ;;  %v113_v40 = vld [vmem:[%s3572_s2 + $0x20] sm:$0xff] }
  0x58   :  { %3675 = vst [vmem:[#allocation40_spill] sm:$0xff] %v3145_v41  ;;  %2085 = vmatpush1.bf16.msra.mxu1 %v3145_v41  ;;  %v3174_v18 = vpack.c.bf16 %v184_v59, %v179_v31  ;;  %v3192_v30 = vpack.c.bf16 %v186_v24, %v181_v32  ;;  %v3682_v31 = vmov 0.0|0.0   ;;  %v3202_v59 = vld [vmem:[%s3573_s4] ss:$0 sm:$0xff] }
  0x59   :  { %2113 = vmatpush1.bf16.msra.mxu0 %v3120_v44  ;;  %3678 = vst [vmem:[#allocation43_spill] sm:$0xff] %v3172_v11  ;;  %v187_v44 = vld [vmem:[%s3572_s2 + $0x270] sm:$0xff]  ;;  %2087 = vmatprep.subr.bf16.mxu1 %v3172_v11 }
  0x5a   :  { %2115 = vmatprep.subr.bf16.mxu0 %v3147_v6  ;;  %3679 = vst [vmem:[#allocation44_spill] sm:$0xff] %v3174_v18  ;;  %v3185_v29 = vpack.c.bf16 %v187_v44, %v182_v55  ;;  %3681 = vst [vmem:[#allocation46_spill] sm:$0xff] %v3192_v30 }
  0x5c   :  { %3680 = vst [vmem:[#allocation45_spill] sm:$0xff] %v3185_v29  ;;  %2089 = vmatpush1.bf16.msra.mxu1 %v3174_v18 }
  0x5d   :  { %2117 = vmatpush1.bf16.msra.mxu0 %v3159_v1  ;;  %2122 = vmatprep.subr.bf16.mxu1 %v3682_v31 }
  0x5e   :  { %2119 = vmatprep.subr.bf16.mxu0 %v3185_v29 }
  0x61   :  { %2121 = vmatpush1.bf16.msra.mxu0 %v3192_v30 }
  0x62   :  { %2147 = vmatprep.subr.bf16.mxu0 %v2531_v3 }
  0xf7   :  { %v1532_v44 = vpop.f32.mrb[0].mxu0 }
  0xf8   :  { %v1533_v55 = vpop.f32.mrb[1].mxu0 }
  0xf9   :  { %v1567_v1 = vpop.f32.mrb[0].mxu1  ;;  %v1534_v32 = vadd.f32 %v1533_v55, %v1532_v44  ;;  %v143_v55 = vld [vmem:[%s3572_s2 + $0x110] sm:$0xff] }
  0xfa   :  { %v1568_v24 = vpop.f32.mrb[1].mxu1 }
  0xfb   :  { %v1569_v6 = vadd.f32 %v1568_v24, %v1567_v1  ;;  %v270_v29 = vadd.f32 %v1534_v32, %v3202_v59  ;;  %v118_v1 = vld [vmem:[%s3572_s2 + $0x48] sm:$0xff]  ;;  %v148_v32 = vld [vmem:[%s3572_s2 + $0x138] sm:$0xff] }
  0xfc   :  { %v3270_v24 = vpack.c.bf16 %v148_v32, %v143_v55  ;;  %v173_v55 = vld [vmem:[%s3572_s2 + $0x200] sm:$0xff]  ;;  %v178_v32 = vld [vmem:[%s3572_s2 + $0x228] sm:$0xff] }
  0xfd   :  { %v340_v18 = vadd.f32 %v1569_v6, %v270_v29  ;;  %v3214_v29 = vld [vmem:[%s3574_s5] sm:$0xff]  ;;  %v3216_v6 = vpack.c.bf16 %v118_v1, %v113_v40  ;;  %v3613_v40 = vmov 1.0  }
  0xfe   :  { %v153_v1 = vld [vmem:[%s3572_s2 + $0x160] sm:$0xff] }
 0x117   :  { %v409_v11 = vpop.f32.mrb[2].mxu0 }
 0x118   :  { %v410_v41 = vadd.f32 %v409_v11, %v340_v18  ;;  %v1829_v50 = vpop.f32.mrb[3].mxu0  ;;  %v133_v18 = vld [vmem:[%s3572_s2 + $0xc0] sm:$0xff] }
 0x11a   :  { %v413_v30 = vsub.f32 0.0, %v410_v41 }
 0x11c   :  { %v414_v58 = vmul.f32 1.442695, %v413_v30  ;;  %v138_v30 = vld [vmem:[%s3572_s2 + $0xe8] sm:$0xff] }
 0x11d   :  { %v3258_v44 = vpack.c.bf16 %v138_v30, %v133_v18  ;;  %v168_v18 = vld [vmem:[%s3572_s2 + $0x1d8] sm:$0xff] }
 0x11e   :  { %2415 = vpow2.f32 %v414_v58  ;;  %v3683_v58 = vmov 0.0  }
 0x128   :  { %v2416_v3 = vpop.eup %2415 }
 0x129   :  { %v416_v23 = vadd.f32 1.0, %v2416_v3  ;;  %v123_v3 = vld [vmem:[%s3572_s2 + $0x70] sm:$0xff] }
 0x12b   :  { %2417 = vrcp.f32 %v416_v23  ;;  %v128_v23 = vld [vmem:[%s3572_s2 + $0x98] sm:$0xff] }
 0x12c   :  { %v3244_v11 = vpack.c.bf16 %v128_v23, %v123_v3  ;;  %v158_v3 = vld [vmem:[%s3572_s2 + $0x188] sm:$0xff] }
 0x12d   :  { %v3282_v23 = vpack.c.bf16 %v158_v3, %v153_v1  ;;  %v3306_v1 = vpack.c.bf16 %v178_v32, %v173_v55  ;;  %v183_v3 = vld [vmem:[%s3572_s2 + $0x250] sm:$0xff]  ;;  %v425_v32 = vld [vmem:[%s3576_s6 + $0x18] sm:$0xff] }
 0x12e   :  { %v424_v55 = vld [vmem:[%s3576_s6 + $0x10] sm:$0xff] }
 0x135   :  { %v3218_v41 = vpop.eup %2417 }
 0x136   :  { %vm418_vm1 = vcmp.lt.f32.partialorder %v3214_v29, %v3218_v41  ;;  %v422_v29 = vld [vmem:[%s3576_s6] sm:$0xff]  ;;  %v423_v41 = vld [vmem:[%s3576_s6 + $0x8] sm:$0xff] }
 0x137   :  { %v1464_v50 = vsel %vm418_vm1, 1.0, %v3683_v58  ;;  %1465 = vmatmul.mubr.msk.f32.vlgmr.msra.gmra.mrb[2].mxu1 %vm418_vm1, %v3613_v40  ;;  %1466 = vmatmul.mubr.msk.f32.vlgmr.msra.gmra.mrb[4].mxu0 %vm418_vm1, %v3613_v40  ;;  %2419 = vlog2.f32 %v422_v29 }
 0x138   :  { %421 = vst [vmem:[%s3575_s9] sm:$0xff] %v1464_v50  ;;  %2124 = vmatpush3.bf16.msra.mxu1 %v3216_v6  ;;  %1862 = vmatprep.mubr.msk.f32.mxu1 %vm2468_vm0, %v3683_v58  ;;  %v163_v50 = vld [vmem:[%s3572_s2 + $0x1b0] sm:$0xff]  ;;  %2421 = vlog2.f32 %v423_v41 }
 0x139   :  { %2125 = vmatprep.subr.bf16.mxu1 %v3682_v31  ;;  %2149 = vmatpush3.bf16.msra.mxu0 %v2542_v7  ;;  %v3294_v30 = vpack.c.bf16 %v168_v18, %v163_v50  ;;  %v188_v50 = vld [vmem:[%s3572_s2 + $0x278] sm:$0xff]  ;;  %2423 = vlog2.f32 %v424_v55  ;;  %v426_v55 = vld [vmem:[%s3576_s6 + $0x20] sm:$0xff] }
 0x13a   :  { %2151 = vmatprep.subr.bf16.mxu0 %v2569_v16  ;;  %v3318_v18 = vpack.c.bf16 %v188_v50, %v183_v3  ;;  %2425 = vlog2.f32 %v425_v32 }
 0x13c   :  { %2127 = vmatpush3.bf16.msra.mxu1 %v3244_v11  ;;  %3684 = vst [vmem:[#allocation47_spill] sm:$0xff] %v3318_v18 }
 0x13d   :  { %2128 = vmatprep.subr.bf16.mxu1 %v3682_v31  ;;  %2153 = vmatpush3.bf16.msra.mxu0 %v2571_v17 }
 0x13e   :  { %2155 = vmatprep.subr.bf16.mxu0 %v2597_v26 }
 0x140   :  { %2130 = vmatpush3.bf16.msra.mxu1 %v3258_v44 }
 0x141   :  { %2131 = vmatprep.subr.bf16.mxu1 %v3682_v31  ;;  %2157 = vmatpush3.bf16.msra.mxu0 %v2619_v33 }
 0x142   :  { %2159 = vmatprep.subr.bf16.mxu0 %v2636_v39 }
 0x144   :  { %2133 = vmatpush3.bf16.msra.mxu1 %v3270_v24 }
 0x145   :  { %2134 = vmatprep.subr.bf16.mxu1 %v3682_v31  ;;  %2161 = vmatpush3.bf16.msra.mxu0 %v2663_v48 }
 0x146   :  { %2163 = vmatprep.subr.bf16.mxu0 %v2675_v52 }
 0x148   :  { %2136 = vmatpush3.bf16.msra.mxu1 %v3282_v23 }
 0x149   :  { %2137 = vmatprep.subr.bf16.mxu1 %v3682_v31  ;;  %2165 = vmatpush3.bf16.msra.mxu0 %v2705_v62 }
 0x14a   :  { %2167 = vmatprep.subr.bf16.mxu0 %v2711_v0 }
 0x14c   :  { %2139 = vmatpush3.bf16.msra.mxu1 %v3294_v30 }
 0x14d   :  { %2140 = vmatprep.subr.bf16.mxu1 %v3682_v31  ;;  %2169 = vmatpush3.bf16.msra.mxu0 %v2741_v14 }
 0x14e   :  { %2171 = vmatprep.subr.bf16.mxu0 %v2753_v20 }
 0x150   :  { %2142 = vmatpush3.bf16.msra.mxu1 %v3306_v1 }
 0x151   :  { %2143 = vmatprep.subr.bf16.mxu1 %v3682_v31  ;;  %2173 = vmatpush3.bf16.msra.mxu0 %v2783_v35 }
 0x152   :  { %2175 = vmatprep.subr.bf16.mxu0 %v2789_v37 }
 0x154   :  { %2145 = vmatpush3.bf16.msra.mxu1 %v3318_v18 }
 0x155   :  { %2179 = vmatprep.subr.bf16.mxu1 %v2544_v8  ;;  %2177 = vmatpush3.bf16.msra.mxu0 %v2807_v46 }
 0x156   :  { %2210 = vmatprep.subr.bf16.mxu0 %v3682_v31 }
 0x157   :  { %1863 = vmatmul.mubr.msk.f32.vlgmr.msra.gmra.mrb[4].mxu1 %vm418_vm1, %v3613_v40 }
 0x158   :  { %2181 = vmatpush3.bf16.msra.mxu1 %v2556_v12 }
 0x159   :  { %2183 = vmatprep.subr.bf16.mxu1 %v2583_v21 }
 0x15c   :  { %2185 = vmatpush3.bf16.msra.mxu1 %v2595_v25 }
 0x15d   :  { %2187 = vmatprep.subr.bf16.mxu1 %v2621_v34 }
 0x160   :  { %2189 = vmatpush3.bf16.msra.mxu1 %v2634_v38 }
 0x161   :  { %2191 = vmatprep.subr.bf16.mxu1 %v2648_v43 }
 0x164   :  { %2193 = vmatpush3.bf16.msra.mxu1 %v2673_v51 }
 0x165   :  { %2195 = vmatprep.subr.bf16.mxu1 %v2687_v56 }
 0x168   :  { %2197 = vmatpush3.bf16.msra.mxu1 %v2709_v63  ;;  %v428_v63 = vlaneseq }
 0x169   :  { %2199 = vmatprep.subr.bf16.mxu1 %v2723_v5 }
 0x16a   :  { %v429_v56 = vshrl.u32 %v428_v63, 7 }
 0x16c   :  { %2201 = vmatpush3.bf16.msra.mxu1 %v2751_v19 }
 0x16d   :  { %2203 = vmatprep.subr.bf16.mxu1 %v2765_v27 }
 0x170   :  { %2205 = vmatpush3.bf16.msra.mxu1 %v2787_v36 }
 0x171   :  { %2207 = vmatprep.subr.bf16.mxu1 %v2798_v42 }
 0x174   :  { %2209 = vmatpush3.bf16.msra.mxu1 %v2811_v47 }
 0x175   :  { %2235 = vmatprep.subr.bf16.mxu1 %v2915_v45  ;;  %v2420_v45 = vpop.eup %2419 }
 0x176   :  { %v2422_v3 = vpop.eup %2421  ;;  %v666_v40 = vmul.f32 0.6931472, %v2420_v45 }
 0x177   :  { %v2424_v50 = vpop.eup %2423  ;;  %v668_v47 = vmul.f32 0.6931472, %v2422_v3  ;;  %v430_v3 = vsub.s32 0, %v429_v56 }
 0x178   :  { %v2426_v42 = vpop.eup %2425  ;;  %v670_v36 = vmul.f32 0.6931472, %v2424_v50  ;;  %v675_v27 = vsub.f32 0.0, %v666_v40 }
 0x179   :  { %v676_v29 = vsub.f32 0.0, %v668_v47  ;;  %v672_v19 = vmul.f32 0.6931472, %v2426_v42  ;;  %v189_v42 = vld [vmem:[%s3577_s3] sm:$0x1f] }
 0x17a   :  { %v677_v5 = vsub.f32 0.0, %v670_v36  ;;  %2427 = vlog2.f32 %v675_v27  ;;  %v438_v36 = vsub.s32 2, %v429_v56  ;;  %v434_v27 = vsub.s32 1, %v429_v56 }
 0x17b   :  { %2429 = vlog2.f32 %v676_v29  ;;  %v678_v41 = vsub.f32 0.0, %v672_v19  ;;  %v3365_v63 = vrot.slane %v189_v42, %v430_v3 }
 0x17c   :  { %2431 = vlog2.f32 %v677_v5  ;;  %v442_v5 = vsub.s32 3, %v429_v56  ;;  %v3367_v29 = vrot.slane %v189_v42, %v438_v36  ;;  %v3369_v51 = vrot.slane %v189_v42, %v434_v27 }
 0x17d   :  { %2433 = vlog2.f32 %v678_v41  ;;  %3685 = vst [vmem:[#allocation48_spill] sm:$0xff] %v3365_v63 }
 0x17e   :  { %2435 = vlog2.f32 %v426_v55  ;;  %3686 = vst [vmem:[#allocation49_spill] sm:$0xff] %v3369_v51  ;;  %v3371_v25 = vrot.slane %v189_v42, %v442_v5 }
 0x184   :  { %v2428_v32 = vpop.eup %2427 }
 0x185   :  { %v2430_v45 = vpop.eup %2429  ;;  %v681_v19 = vmul.f32 0.6931472, %v2428_v32 }
 0x186   :  { %v2432_v47 = vpop.eup %2431  ;;  %v683_v40 = vmul.f32 0.6931472, %v2430_v45 }
 0x187   :  { %v2434_v50 = vpop.eup %2433  ;;  %v685_v41 = vmul.f32 0.6931472, %v2432_v47  ;;  %v690_v43 = vsub.f32 0.0, %v681_v19 }
 0x188   :  { %v691_v34 = vsub.f32 0.0, %v683_v40  ;;  %v687_v21 = vmul.f32 0.6931472, %v2434_v50  ;;  %v2436_v8 = vpop.eup %2435  ;;  %v2471_v50 = vmov 0  }
 0x189   :  { %v692_v3 = vsub.f32 0.0, %v685_v41  ;;  %v674_v40 = vmul.f32 0.6931472, %v2436_v8 }
 0x18a   :  { %v693_v18 = vsub.f32 0.0, %v687_v21 }
 0x18b   :  { %v679_v41 = vsub.f32 0.0, %v674_v40  ;;  %v3705_v40 = vld [vmem:[#allocation33_spill] sm:$0xff] }
 0x18d   :  { %2437 = vlog2.f32 %v679_v41  ;;  %v3709_v41 = vld [vmem:[#allocation41_spill] sm:$0xff] }
 0x20a   :  { %v519_v55 = vpop.f32.mrb[2].mxu1  ;;  %v590_v38 = vpop.f32.mrb[4].mxu0 }
 0x20b   :  { %v520_v12 = vadd.f32 %v519_v55, %v3365_v63  ;;  %v521_v32 = vpop.f32.mrb[3].mxu1  ;;  %v592_v45 = vpop.f32.mrb[5].mxu0  ;;  %v591_v46 = vadd.f32 %v590_v38, %v3367_v29 }
 0x20c   :  { %v522_v36 = vadd.f32 %v521_v32, %v3369_v51  ;;  %v593_v19 = vadd.f32 %v592_v45, %v3371_v25 }
 0x20d   :  { %v695_v47 = vadd.f32 %v690_v43, %v520_v12  ;;  %v697_v37 = vadd.f32 %v692_v3, %v591_v46  ;;  %v2438_v12 = vpop.eup %2437 }
 0x20e   :  { %v696_v27 = vadd.f32 %v691_v34, %v522_v36  ;;  %v698_v63 = vadd.f32 %v693_v18, %v593_v19  ;;  %v446_v34 = vsub.s32 4, %v429_v56  ;;  %v689_v43 = vmul.f32 0.6931472, %v2438_v12  ;;  %v3689_v56 = vld [vmem:[#allocation22_spill] sm:$0xff]  ;;  %v3704_v19 = vld [vmem:[#allocation32_spill] sm:$0xff]  ;;  %v3711_v12 = vld [vmem:[#allocation45_spill] sm:$0xff] }
 0x210   :  { %vm700_vm2 = vcmp.gt.f32.partialorder %v696_v27, %v695_v47  ;;  %v3378_v21 = vrot.slane %v189_v42, %v446_v34  ;;  %v694_v46 = vsub.f32 0.0, %v689_v43  ;;  %v3700_v42 = vld [vmem:[#allocation28_spill] sm:$0xff]  ;;  %v3712_v34 = vld [vmem:[#allocation46_spill] sm:$0xff] }
 0x211   :  { %v701_v5 = vsel %vm700_vm2, %v696_v27, %v695_v47  ;;  %v702_v55 = vsel %vm700_vm2, 1, %v2471_v50  ;;  %v3702_v47 = vld [vmem:[#allocation30_spill] sm:$0xff]  ;;  %v3703_v27 = vld [vmem:[#allocation31_spill] sm:$0xff] }
 0x212   :  { %vm703_vm3 = vcmp.gt.f32.partialorder %v697_v37, %v701_v5  ;;  %v3713_v43 = vld [vmem:[#allocation2_spill] sm:$0xff] }
 0x213   :  { %v704_v35 = vsel %vm703_vm3, %v697_v37, %v701_v5  ;;  %v705_v38 = vsel %vm703_vm3, 2, %v702_v55  ;;  %v3687_v37 = vmov 1.0   ;;  %v3706_v5 = vld [vmem:[#allocation34_spill] sm:$0xff]  ;;  %v3707_v55 = vld [vmem:[#allocation37_spill] sm:$0xff] }
 0x214   :  { %vm706_vm4 = vcmp.gt.f32.partialorder %v698_v63, %v704_v35 }
 0x215   :  { %v708_v32 = vsel %vm706_vm4, 3, %v705_v38  ;;  %v707_v51 = vsel %vm706_vm4, %v698_v63, %v704_v35  ;;  %v3690_v35 = vld [vmem:[#allocation36_spill] sm:$0xff]  ;;  %v3701_v63 = vld [vmem:[#allocation29_spill] sm:$0xff]  ;;  %v3708_v38 = vld [vmem:[#allocation38_spill] sm:$0xff] }
 0x22a   :  { %v661_v8 = vpop.f32.mrb[4].mxu1 }
 0x22b   :  { %v662_v45 = vadd.f32 %v661_v8, %v3378_v21  ;;  %v1864_v3 = vpop.f32.mrb[5].mxu1 }
 0x22d   :  { %v699_v36 = vadd.f32 %v694_v46, %v662_v45 }
 0x22f   :  { %vm709_vm5 = vcmp.gt.f32.partialorder %v699_v36, %v707_v51  ;;  %v3688_v51 = vld [vmem:[#allocation35_spill] sm:$0xff] }
 0x230   :  { %v710_v18 = vsel %vm709_vm5, 4, %v708_v32  ;;  %v3710_v32 = vld [vmem:[#allocation42_spill] sm:$0xff] }
 0x231   :  { %vm714_vm6 = vcmp.eq.s32.totalorder %v710_v18, 1  ;;  %vm720_vm7 = vcmp.eq.s32.totalorder %v710_v18, 3  ;;  %vm711_vm8 = vcmp.eq.s32.totalorder %v710_v18, 0  ;;  %vm717_vm9 = vcmp.eq.s32.totalorder %v710_v18, 2 }
 0x232   :  { %1474 = vmatprep.mubr.msk.f32.mxu0 %vm714_vm6, %v3687_v37  ;;  %1476 = vmatprep.mubr.msk.f32.mxu1 %vm720_vm7, %v3687_v37  ;;  %vm723_vm10 = vcmp.eq.s32.totalorder %v710_v18, 4 }
 0x233   :  { %1475 = vmatmul.mubr.msk.f32.vlgmr.msra.gmra.mrb[6].mxu0 %vm711_vm8, %v3687_v37  ;;  %1477 = vmatmul.mubr.msk.f32.vlgmr.msra.gmra.mrb[6].mxu1 %vm717_vm9, %v3687_v37 }
 0x234   :  { %2212 = vmatpush3.bf16.msra.mxu0 %v2824_v54  ;;  %1897 = vmatprep.mubr.msk.f32.mxu0 %vm2468_vm0, %v3683_v58 }
 0x235   :  { %2213 = vmatprep.subr.bf16.mxu0 %v3682_v31  ;;  %2237 = vmatpush1.bf16.msra.mxu1 %v2927_v57  ;;  %v3691_v57 = vld [vmem:[#allocation39_spill] sm:$0xff] }
 0x236   :  { %2239 = vmatprep.subr.bf16.mxu1 %v2950_v13  ;;  %1016 = vmatprep.mubr.f32.mxu1 %v3683_v58  ;;  %v3692_v13 = vld [vmem:[#allocation23_spill] sm:$0xff] }
 0x238   :  { %2215 = vmatpush3.bf16.msra.mxu0 %v2838_v60 }
 0x239   :  { %2216 = vmatprep.subr.bf16.mxu0 %v3682_v31  ;;  %2241 = vmatpush1.bf16.msra.mxu1 %v2962_v28  ;;  %v3694_v28 = vld [vmem:[#allocation43_spill] sm:$0xff] }
 0x23a   :  { %2243 = vmatprep.subr.bf16.mxu1 %v2986_v53  ;;  %v3695_v53 = vld [vmem:[#allocation24_spill] sm:$0xff] }
 0x23c   :  { %2218 = vmatpush3.bf16.msra.mxu0 %v2851_v4 }
 0x23d   :  { %2219 = vmatprep.subr.bf16.mxu0 %v3682_v31  ;;  %2245 = vmatpush1.bf16.msra.mxu1 %v2998_v9  ;;  %v3696_v9 = vld [vmem:[#allocation25_spill] sm:$0xff] }
 0x23e   :  { %2247 = vmatprep.subr.bf16.mxu1 %v3022_v49  ;;  %v3697_v49 = vld [vmem:[#allocation44_spill] sm:$0xff] }
 0x240   :  { %2221 = vmatpush3.bf16.msra.mxu0 %v2861_v10 }
 0x241   :  { %2222 = vmatprep.subr.bf16.mxu0 %v3682_v31  ;;  %2249 = vmatpush1.bf16.msra.mxu1 %v3034_v61  ;;  %v3698_v61 = vld [vmem:[#allocation26_spill] sm:$0xff] }
 0x242   :  { %2251 = vmatprep.subr.bf16.mxu1 %v3058_v2  ;;  %v3693_v2 = vld [vmem:[#allocation40_spill] sm:$0xff] }
 0x244   :  { %2224 = vmatpush3.bf16.msra.mxu0 %v2871_v15 }
 0x245   :  { %2225 = vmatprep.subr.bf16.mxu0 %v3682_v31  ;;  %2253 = vmatpush1.bf16.msra.mxu1 %v3070_v22  ;;  %v3699_v22 = vld [vmem:[#allocation27_spill] sm:$0xff] }
 0x246   :  { %2255 = vmatprep.subr.bf16.mxu1 %v3688_v51 }
 0x248   :  { %2227 = vmatpush3.bf16.msra.mxu0 %v3689_v56 }
 0x249   :  { %2228 = vmatprep.subr.bf16.mxu0 %v3682_v31  ;;  %2257 = vmatpush1.bf16.msra.mxu1 %v3690_v35 }
 0x24a   :  { %2259 = vmatprep.subr.bf16.mxu1 %v3691_v57 }
 0x24c   :  { %2230 = vmatpush3.bf16.msra.mxu0 %v3692_v13 }
 0x24d   :  { %2231 = vmatprep.subr.bf16.mxu0 %v3682_v31  ;;  %2261 = vmatpush1.bf16.msra.mxu1 %v3693_v2 }
 0x24e   :  { %2263 = vmatprep.subr.bf16.mxu1 %v3694_v28 }
 0x250   :  { %2233 = vmatpush3.bf16.msra.mxu0 %v3695_v53 }
 0x251   :  { %2267 = vmatprep.subr.bf16.mxu0 %v3696_v9  ;;  %2265 = vmatpush1.bf16.msra.mxu1 %v3697_v49 }
 0x252   :  { %2298 = vmatprep.subr.bf16.mxu1 %v3682_v31 }
 0x253   :  { %1898 = vmatmul.mubr.msk.f32.vlgmr.msra.gmra.mrb[8].mxu0 %vm723_vm10, %v3687_v37 }
 0x254   :  { %2269 = vmatpush1.bf16.msra.mxu0 %v3698_v61  ;;  %1087 = vmatprep.mubr.f32.mxu0 %v3683_v58 }
 0x255   :  { %2271 = vmatprep.subr.bf16.mxu0 %v3699_v22 }
 0x258   :  { %2273 = vmatpush1.bf16.msra.mxu0 %v3700_v42  ;;  %v1473_v42 = vld [vmem:[%s3574_s5 + $0x8] sm:$0xff] }
 0x259   :  { %2275 = vmatprep.subr.bf16.mxu0 %v3701_v63 }
 0x25c   :  { %2277 = vmatpush1.bf16.msra.mxu0 %v3702_v47  ;;  %v3733_v47 = vld [vmem:[#allocation21_spill] sm:$0xff] }
 0x25d   :  { %2279 = vmatprep.subr.bf16.mxu0 %v3703_v27  ;;  %v1480_v27 = vld [vmem:[%s3576_s6 + $0x28] sm:$0xff] }
 0x260   :  { %2281 = vmatpush1.bf16.msra.mxu0 %v3704_v19  ;;  %v1481_v19 = vld [vmem:[%s3576_s6 + $0x30] sm:$0xff] }
 0x261   :  { %2283 = vmatprep.subr.bf16.mxu0 %v3705_v40  ;;  %v1482_v40 = vld [vmem:[%s3576_s6 + $0x38] sm:$0xff] }
 0x264   :  { %2285 = vmatpush1.bf16.msra.mxu0 %v3706_v5  ;;  %v1483_v5 = vld [vmem:[%s3576_s6 + $0x40] sm:$0xff] }
 0x265   :  { %2287 = vmatprep.subr.bf16.mxu0 %v3707_v55 }
 0x268   :  { %2289 = vmatpush1.bf16.msra.mxu0 %v3708_v38 }
 0x269   :  { %2291 = vmatprep.subr.bf16.mxu0 %v3709_v41 }
 0x26c   :  { %2293 = vmatpush1.bf16.msra.mxu0 %v3710_v32 }
 0x26d   :  { %2295 = vmatprep.subr.bf16.mxu0 %v3711_v12 }
 0x270   :  { %2297 = vmatpush1.bf16.msra.mxu0 %v3712_v34 }
 0x271   :  { %2323 = vmatprep.subr.bf16.mxu0 %v3713_v43 }
 0x306   :  { %v1636_v46 = vpop.f32.mrb[6].mxu0  ;;  %v1671_v8 = vpop.f32.mrb[6].mxu1 }
 0x307   :  { %v1637_v45 = vpop.f32.mrb[7].mxu0  ;;  %v1672_v3 = vpop.f32.mrb[7].mxu1 }
 0x308   :  { %v1638_v36 = vadd.f32 %v1637_v45, %v1636_v46  ;;  %v1673_v18 = vadd.f32 %v1672_v3, %v1671_v8 }
 0x30a   :  { %v795_v51 = vadd.f32 %v1638_v36, %v3202_v59 }
 0x30c   :  { %v865_v35 = vadd.f32 %v1673_v18, %v795_v51  ;;  %v1484_v18 = vld [vmem:[%s3576_s6 + $0x48] sm:$0xff] }
 0x326   :  { %v934_v57 = vpop.f32.mrb[8].mxu0 }
 0x327   :  { %v935_v2 = vadd.f32 %v934_v57, %v865_v35  ;;  %v1899_v28 = vpop.f32.mrb[9].mxu0 }
 0x329   :  { %v938_v9 = vsub.f32 0.0, %v935_v2 }
 0x32b   :  { %v939_v49 = vmul.f32 1.442695, %v938_v9 }
 0x32d   :  { %2439 = vpow2.f32 %v939_v49 }
 0x337   :  { %v2440_v61 = vpop.eup %2439 }
 0x338   :  { %v941_v22 = vadd.f32 1.0, %v2440_v61 }
 0x33a   :  { %2441 = vrcp.f32 %v941_v22 }
 0x33b   :  { %2443 = vlog2.f32 %v1480_v27 }
 0x33c   :  { %2445 = vlog2.f32 %v1481_v19 }
 0x33d   :  { %2447 = vlog2.f32 %v1482_v40 }
 0x33e   :  { %2449 = vlog2.f32 %v1483_v5 }
 0x344   :  { %v2442_v63 = vpop.eup %2441 }
 0x345   :  { %vm943_vm11 = vcmp.lt.f32.partialorder %v1473_v42, %v2442_v63  ;;  %v2444_v55 = vpop.eup %2443 }
 0x346   :  { %1485 = vmatmul.mubr.msk.f32.vlgmr.msra.gmra.mrb[8].mxu1 %vm943_vm11, %v3687_v37  ;;  %1486 = vmatmul.mubr.msk.f32.vlgmr.msra.gmra.mrb[10].mxu0 %vm943_vm11, %v3687_v37  ;;  %v2446_v38 = vpop.eup %2445  ;;  %v1165_v32 = vmul.f32 0.6931472, %v2444_v55 }
 0x347   :  { %2300 = vmatpush3.bf16.msra.mxu1 %v3216_v6  ;;  %1932 = vmatprep.mubr.msk.f32.mxu1 %vm2468_vm0, %v3683_v58  ;;  %v3726_v6 = vld [vmem:[#allocation11_spill] sm:$0xff]  ;;  %v2448_v41 = vpop.eup %2447  ;;  %v1167_v12 = vmul.f32 0.6931472, %v2446_v38 }
 0x348   :  { %2301 = vmatprep.subr.bf16.mxu1 %v3682_v31  ;;  %2325 = vmatpush3.bf16.msra.mxu0 %v2542_v7  ;;  %v3714_v7 = vld [vmem:[#allocation16_spill] sm:$0xff]  ;;  %v2450_v34 = vpop.eup %2449  ;;  %v1169_v43 = vmul.f32 0.6931472, %v2448_v41  ;;  %v1174_v46 = vsub.f32 0.0, %v1165_v32 }
 0x349   :  { %2327 = vmatprep.subr.bf16.mxu0 %v2569_v16  ;;  %v3715_v16 = vld [vmem:[#allocation18_spill] sm:$0xff]  ;;  %v1175_v8 = vsub.f32 0.0, %v1167_v12  ;;  %v1171_v45 = vmul.f32 0.6931472, %v2450_v34 }
 0x34a   :  { %v1176_v3 = vsub.f32 0.0, %v1169_v43  ;;  %2451 = vlog2.f32 %v1174_v46 }
 0x34b   :  { %2303 = vmatpush3.bf16.msra.mxu1 %v3244_v11  ;;  %v3727_v11 = vld [vmem:[#allocation12_spill] sm:$0xff]  ;;  %2453 = vlog2.f32 %v1175_v8  ;;  %v1177_v36 = vsub.f32 0.0, %v1171_v45 }
 0x34c   :  { %2304 = vmatprep.subr.bf16.mxu1 %v3682_v31  ;;  %2329 = vmatpush3.bf16.msra.mxu0 %v2571_v17  ;;  %v3716_v17 = vld [vmem:[#allocation47_spill] sm:$0xff]  ;;  %2455 = vlog2.f32 %v1176_v3 }
 0x34d   :  { %2331 = vmatprep.subr.bf16.mxu0 %v2597_v26  ;;  %v3717_v26 = vld [vmem:[#allocation3_spill] sm:$0xff]  ;;  %2457 = vlog2.f32 %v1177_v36 }
 0x34e   :  { %2459 = vlog2.f32 %v1484_v18 }
 0x34f   :  { %2306 = vmatpush3.bf16.msra.mxu1 %v3258_v44  ;;  %v3728_v44 = vld [vmem:[#allocation13_spill] sm:$0xff] }
 0x350   :  { %2307 = vmatprep.subr.bf16.mxu1 %v3682_v31  ;;  %2333 = vmatpush3.bf16.msra.mxu0 %v2619_v33  ;;  %v3718_v33 = vld [vmem:[#allocation20_spill] sm:$0xff] }
 0x351   :  { %2335 = vmatprep.subr.bf16.mxu0 %v2636_v39  ;;  %v3719_v39 = vld [vmem:[#allocation4_spill] sm:$0xff] }
 0x353   :  { %2309 = vmatpush3.bf16.msra.mxu1 %v3270_v24  ;;  %v3729_v24 = vld [vmem:[#allocation14_spill] sm:$0xff] }
 0x354   :  { %2310 = vmatprep.subr.bf16.mxu1 %v3682_v31  ;;  %2337 = vmatpush3.bf16.msra.mxu0 %v2663_v48  ;;  %v3720_v48 = vld [vmem:[#allocation5_spill] sm:$0xff]  ;;  %v2452_v51 = vpop.eup %2451 }
 0x355   :  { %2339 = vmatprep.subr.bf16.mxu0 %v2675_v52  ;;  %v3721_v52 = vld [vmem:[#allocation6_spill] sm:$0xff]  ;;  %v2454_v35 = vpop.eup %2453  ;;  %v1180_v2 = vmul.f32 0.6931472, %v2452_v51 }
 0x356   :  { %v2456_v57 = vpop.eup %2455  ;;  %v1182_v28 = vmul.f32 0.6931472, %v2454_v35 }
 0x357   :  { %2312 = vmatpush3.bf16.msra.mxu1 %v3282_v23  ;;  %v3730_v23 = vld [vmem:[#allocation15_spill] sm:$0xff]  ;;  %v2458_v9 = vpop.eup %2457  ;;  %v1184_v49 = vmul.f32 0.6931472, %v2456_v57  ;;  %v1189_v61 = vsub.f32 0.0, %v1180_v2 }
 0x358   :  { %2313 = vmatprep.subr.bf16.mxu1 %v3682_v31  ;;  %2341 = vmatpush3.bf16.msra.mxu0 %v2705_v62  ;;  %v3722_v62 = vld [vmem:[#allocation7_spill] sm:$0xff]  ;;  %v1190_v63 = vsub.f32 0.0, %v1182_v28 }
 0x359   :  { %2343 = vmatprep.subr.bf16.mxu0 %v2711_v0  ;;  %v3723_v0 = vld [vmem:[#allocation8_spill] sm:$0xff] }
 0x35b   :  { %2315 = vmatpush3.bf16.msra.mxu1 %v3294_v30  ;;  %v3731_v30 = vld [vmem:[#allocation17_spill] sm:$0xff] }
 0x35c   :  { %2316 = vmatprep.subr.bf16.mxu1 %v3682_v31  ;;  %2345 = vmatpush3.bf16.msra.mxu0 %v2741_v14  ;;  %v3724_v14 = vld [vmem:[#allocation9_spill] sm:$0xff] }
 0x35d   :  { %2347 = vmatprep.subr.bf16.mxu0 %v2753_v20  ;;  %v3725_v20 = vld [vmem:[#allocation10_spill] sm:$0xff] }
 0x35f   :  { %2318 = vmatpush3.bf16.msra.mxu1 %v3306_v1  ;;  %v3732_v1 = vld [vmem:[#allocation19_spill] sm:$0xff] }
 0x360   :  { %2319 = vmatprep.subr.bf16.mxu1 %v3682_v31  ;;  %2349 = vmatpush3.bf16.msra.mxu0 %v3714_v7  ;;  %v1186_v7 = vmul.f32 0.6931472, %v2458_v9 }
 0x361   :  { %2351 = vmatprep.subr.bf16.mxu0 %v3715_v16  ;;  %v3734_v16 = vld [vmem:[#allocation48_spill] sm:$0xff] }
 0x363   :  { %2321 = vmatpush3.bf16.msra.mxu1 %v3716_v17 }
 0x364   :  { %2355 = vmatprep.subr.bf16.mxu1 %v3717_v26  ;;  %2353 = vmatpush3.bf16.msra.mxu0 %v3718_v33 }
 0x365   :  { %2386 = vmatprep.subr.bf16.mxu0 %v3682_v31 }
 0x366   :  { %1933 = vmatmul.mubr.msk.f32.vlgmr.msra.gmra.mrb[10].mxu1 %vm943_vm11, %v3687_v37 }
 0x367   :  { %2357 = vmatpush3.bf16.msra.mxu1 %v3719_v39 }
 0x368   :  { %2359 = vmatprep.subr.bf16.mxu1 %v3720_v48  ;;  %v1191_v48 = vsub.f32 0.0, %v1184_v49 }
 0x36b   :  { %2361 = vmatpush3.bf16.msra.mxu1 %v3721_v52  ;;  %v3735_v52 = vld [vmem:[#allocation49_spill] sm:$0xff] }
 0x36c   :  { %2363 = vmatprep.subr.bf16.mxu1 %v3722_v62 }
 0x36f   :  { %2365 = vmatpush3.bf16.msra.mxu1 %v3723_v0  ;;  %v2460_v0 = vpop.eup %2459 }
 0x370   :  { %2367 = vmatprep.subr.bf16.mxu1 %v3724_v14 }
 0x373   :  { %2369 = vmatpush3.bf16.msra.mxu1 %v3725_v20 }
 0x374   :  { %2371 = vmatprep.subr.bf16.mxu1 %v3726_v6 }
 0x377   :  { %2373 = vmatpush3.bf16.msra.mxu1 %v3727_v11  ;;  %v1192_v11 = vsub.f32 0.0, %v1186_v7 }
 0x378   :  { %2375 = vmatprep.subr.bf16.mxu1 %v3728_v44 }
 0x37b   :  { %2377 = vmatpush3.bf16.msra.mxu1 %v3729_v24  ;;  %v1173_v24 = vmul.f32 0.6931472, %v2460_v0 }
 0x37c   :  { %2379 = vmatprep.subr.bf16.mxu1 %v3730_v23 }
 0x37f   :  { %2381 = vmatpush3.bf16.msra.mxu1 %v3731_v30 }
 0x380   :  { %2383 = vmatprep.subr.bf16.mxu1 %v3732_v1 }
 0x383   :  { %2385 = vmatpush3.bf16.msra.mxu1 %v3733_v47 }
 0x419   :  { %v1018_v22 = vpop.f32.mrb[8].mxu1  ;;  %v1089_v42 = vpop.f32.mrb[10].mxu0 }
 0x41a   :  { %v1019_v17 = vadd.f32 %v1018_v22, %v3734_v16  ;;  %v1020_v26 = vpop.f32.mrb[9].mxu1  ;;  %v1091_v33 = vpop.f32.mrb[11].mxu0  ;;  %v1090_v39 = vadd.f32 %v1089_v42, %v3367_v29  ;;  %v1178_v29 = vsub.f32 0.0, %v1173_v24 }
 0x41b   :  { %v1021_v62 = vadd.f32 %v1020_v26, %v3735_v52  ;;  %v1092_v6 = vadd.f32 %v1091_v33, %v3371_v25 }
 0x41c   :  { %v1194_v14 = vadd.f32 %v1189_v61, %v1019_v17  ;;  %v1196_v44 = vadd.f32 %v1191_v48, %v1090_v39  ;;  %2461 = vlog2.f32 %v1178_v29 }
 0x41d   :  { %v1195_v20 = vadd.f32 %v1190_v63, %v1021_v62  ;;  %v1197_v1 = vadd.f32 %v1192_v11, %v1092_v6 }
 0x41f   :  { %vm1199_vm12 = vcmp.gt.f32.partialorder %v1195_v20, %v1194_v14 }
 0x420   :  { %v1200_v23 = vsel %vm1199_vm12, %v1195_v20, %v1194_v14  ;;  %v1201_v30 = vsel %vm1199_vm12, 1, %v2471_v50 }
 0x421   :  { %vm1202_vm13 = vcmp.gt.f32.partialorder %v1196_v44, %v1200_v23 }
 0x422   :  { %v1203_v47 = vsel %vm1202_vm13, %v1196_v44, %v1200_v23  ;;  %v1204_v27 = vsel %vm1202_vm13, 2, %v1201_v30 }
 0x423   :  { %vm1205_vm14 = vcmp.gt.f32.partialorder %v1197_v1, %v1203_v47 }
 0x424   :  { %v1207_v19 = vsel %vm1205_vm14, 3, %v1204_v27  ;;  %v1206_v40 = vsel %vm1205_vm14, %v1197_v1, %v1203_v47 }
 0x426   :  { %v2462_v5 = vpop.eup %2461 }
 0x427   :  { %v1188_v55 = vmul.f32 0.6931472, %v2462_v5 }
 0x429   :  { %v1193_v38 = vsub.f32 0.0, %v1188_v55 }
 0x439   :  { %v1160_v25 = vpop.f32.mrb[10].mxu1 }
 0x43a   :  { %v1161_v41 = vadd.f32 %v1160_v25, %v3378_v21  ;;  %v1934_v32 = vpop.f32.mrb[11].mxu1 }
 0x43c   :  { %v1198_v12 = vadd.f32 %v1193_v38, %v1161_v41 }
 0x43e   :  { %vm1208_vm15 = vcmp.gt.f32.partialorder %v1198_v12, %v1206_v40 }
 0x43f   :  { %v1209_v34 = vsel %vm1208_vm15, 4, %v1207_v19 }
 0x440   :  { %vm1213_vm1 = vcmp.eq.s32.totalorder %v1209_v34, 1  ;;  %vm1219_vm2 = vcmp.eq.s32.totalorder %v1209_v34, 3  ;;  %vm1210_vm3 = vcmp.eq.s32.totalorder %v1209_v34, 0  ;;  %vm1216_vm4 = vcmp.eq.s32.totalorder %v1209_v34, 2 }
 0x441   :  { %v1489_v50 = vsel %vm1213_vm1, 1.0, %v3683_v58  ;;  %1494 = vmatprep.mubr.msk.f32.mxu0 %vm1213_vm1, %v3687_v37  ;;  %v1491_v43 = vsel %vm1219_vm2, 1.0, %v3683_v58  ;;  %1496 = vmatprep.mubr.msk.f32.mxu1 %vm1219_vm2, %v3687_v37  ;;  %v1488_v46 = vsel %vm1210_vm3, 1.0, %v3683_v58  ;;  %v1490_v21 = vsel %vm1216_vm4, 1.0, %v3683_v58 }
 0x442   :  { %1446 = vst [vmem:[%s3578_s7 + $0x8] sm:$0xff] %v1489_v50  ;;  %1448 = vst [vmem:[%s3578_s7 + $0x18] sm:$0xff] %v1491_v43  ;;  %1495 = vmatmul.mubr.msk.f32.vlgmr.msra.gmra.mrb[12].mxu0 %vm1210_vm3, %v3687_v37  ;;  %1497 = vmatmul.mubr.msk.f32.vlgmr.msra.gmra.mrb[12].mxu1 %vm1216_vm4, %v3687_v37  ;;  %vm1222_vm5 = vcmp.eq.s32.totalorder %v1209_v34, 4 }
 0x443   :  { %1445 = vst [vmem:[%s3578_s7] sm:$0xff] %v1488_v46  ;;  %1447 = vst [vmem:[%s3578_s7 + $0x10] sm:$0xff] %v1490_v21  ;;  %2388 = vmatpush3.bf16.msra.mxu0 %v2824_v54  ;;  %1967 = vmatprep.mubr.msk.f32.mxu0 %vm2468_vm0, %v3683_v58  ;;  %v1492_v8 = vsel %vm1222_vm5, 1.0, %v3683_v58 }
 0x444   :  { %2389 = vmatprep.subr.bf16.mxu0 %v3682_v31  ;;  %1449 = vst [vmem:[%s3578_s7 + $0x20] sm:$0xff] %v1492_v8 }
 0x447   :  { %2391 = vmatpush3.bf16.msra.mxu0 %v2838_v60 }
 0x448   :  { %2392 = vmatprep.subr.bf16.mxu0 %v3682_v31 }
 0x44b   :  { %2394 = vmatpush3.bf16.msra.mxu0 %v2851_v4 }
 0x44c   :  { %2395 = vmatprep.subr.bf16.mxu0 %v3682_v31 }
 0x44f   :  { %2397 = vmatpush3.bf16.msra.mxu0 %v2861_v10 }
 0x450   :  { %2398 = vmatprep.subr.bf16.mxu0 %v3682_v31 }
 0x453   :  { %2400 = vmatpush3.bf16.msra.mxu0 %v2871_v15 }
 0x454   :  { %2401 = vmatprep.subr.bf16.mxu0 %v3682_v31 }
 0x457   :  { %2403 = vmatpush3.bf16.msra.mxu0 %v3689_v56 }
 0x458   :  { %2404 = vmatprep.subr.bf16.mxu0 %v3682_v31 }
 0x45b   :  { %2406 = vmatpush3.bf16.msra.mxu0 %v3692_v13 }
 0x45c   :  { %2407 = vmatprep.subr.bf16.mxu0 %v3682_v31 }
 0x45f   :  { %2409 = vmatpush3.bf16.msra.mxu0 %v3695_v53 }
 0x462   :  { %1968 = vmatmul.mubr.msk.f32.vlgmr.msra.gmra.mrb[14].mxu0 %vm1222_vm5, %v3687_v37  ;;  %v1493_v37 = vld [vmem:[%s3574_s5 + $0x10] sm:$0xff] }
 0x515   :  { %v1740_v54 = vpop.f32.mrb[12].mxu0  ;;  %v1775_v60 = vpop.f32.mrb[12].mxu1 }
 0x516   :  { %v1741_v4 = vpop.f32.mrb[13].mxu0  ;;  %v1776_v10 = vpop.f32.mrb[13].mxu1 }
 0x517   :  { %v1742_v15 = vadd.f32 %v1741_v4, %v1740_v54  ;;  %v1777_v45 = vadd.f32 %v1776_v10, %v1775_v60 }
 0x519   :  { %v1294_v3 = vadd.f32 %v1742_v15, %v3202_v59 }
 0x51b   :  { %v1364_v56 = vadd.f32 %v1777_v45, %v1294_v3 }
 0x535   :  { %v1433_v36 = vpop.f32.mrb[14].mxu0 }
 0x536   :  { %v1434_v18 = vadd.f32 %v1433_v36, %v1364_v56  ;;  %v1969_v51 = vpop.f32.mrb[15].mxu0 }
 0x538   :  { %v1437_v13 = vsub.f32 0.0, %v1434_v18 }
 0x53a   :  { %v1438_v35 = vmul.f32 1.442695, %v1437_v13 }
 0x53c   :  { %2463 = vpow2.f32 %v1438_v35 }
 0x546   :  { %v2464_v31 = vpop.eup %2463 }
 0x547   :  { %v1440_v53 = vadd.f32 1.0, %v2464_v31 }
 0x549   :  { %2465 = vrcp.f32 %v1440_v53 }
 0x553   :  { %v2466_v57 = vpop.eup %2465 }
 0x554   :  { %vm1442_vm0 = vcmp.lt.f32.partialorder %v1493_v37, %v2466_v57 }
 0x555   :  { %v1499_v2 = vsel %vm1442_vm0, 1.0, %v3683_v58 }
 0x556   :  { %1450 = vst [vmem:[%s3579_s8] sm:$0xff] %v1499_v2 }

</bundles_post_ra>
